<compile_context>
chip_gen: v7x
topology: tpu7x:2x2x1
jax: 0.10.0
libtpu: 0.0.40
codegen_flags: <defaults>
</compile_context>

<pallas_src>
import math
import functools

import jax
import jax.numpy as jnp
from jax.experimental import pallas as pl
from jax.experimental.pallas import tpu as pltpu


def encoder_layer_kernel(x_ref,
                         wqkv_ref, bqkv_ref, wo_ref, bo_ref,
                         g1_ref, be1_ref,
                         w1_ref, b1_ref, w2_ref, b2_ref,
                         g2_ref, be2_ref,
                         o_ref,
                         y_ref, y16_ref, acc_ref,
                         *, nheads, head_dim, batch_block, seq_len, eps):
    """grid = (batch_blocks, ff_tiles).  One batch *block* (Bblk elements) per
    step on axis 0; the feed-forward hidden dim is streamed in tiles along
    axis 1 and accumulated into `acc_ref`.  Attention + LayerNorm1 run once per
    batch block (ff tile 0); LayerNorm2 + output store run on the last tile."""
    fi = pl.program_id(1)
    H, hd, Bb, S = nheads, head_dim, batch_block, seq_len
    D = H * hd
    M = Bb * S

    # ---- self-attention + residual + LayerNorm1 (once per batch block) ----
    @pl.when(fi == 0)
    def _attn_ln1():
        # (Bb, S, D) -> (Bb*S, D): layout-trivial leading-dim merge (S % 8 == 0).
        x = x_ref[...].reshape(M, D).astype(jnp.float32)
        x16 = x.astype(jnp.bfloat16)

        # Q/K/V projections from the (3, D, D)-packed weight: three MXU passes
        # with M = Bb*S rows each (no sub-128-lane slicing of a fused result).
        def proj(i):
            return (jnp.dot(x16, wqkv_ref[i],
                            preferred_element_type=jnp.float32) + bqkv_ref[i])
        q, k, v = proj(0), proj(1), proj(2)

        scale = 1.0 / math.sqrt(hd)
        ctx_heads = []
        # Static per-head lane slices; each head's attention matmuls are
        # batched over the Bb batch elements so the relayout cost is
        # amortized Bb-fold and the einsum pattern matches the known-good
        # Mosaic lowering ('bqd,bkd->bqk').
        # TODO(synk): einshape-based head split + flash KV tiling for large H/S.
        for h in range(H):
            lo, hi = h * hd, (h + 1) * hd
            qh = (q[:, lo:hi] * scale).astype(jnp.bfloat16).reshape(Bb, S, hd)
            kh = k[:, lo:hi].astype(jnp.bfloat16).reshape(Bb, S, hd)
            vh = v[:, lo:hi].astype(jnp.bfloat16).reshape(Bb, S, hd)
            s = jnp.einsum('bqd,bkd->bqk', qh, kh,
                           preferred_element_type=jnp.float32)   # (Bb, S, S) f32
            s = s - jnp.max(s, axis=-1, keepdims=True)
            p = jnp.exp(s)
            # exact reciprocal (still EUP) for closer parity with torch softmax
            p = p * pl.reciprocal(jnp.sum(p, axis=-1, keepdims=True), approx=False)
            ctx = jnp.einsum('bqk,bkd->bqd', p.astype(jnp.bfloat16), vh,
                             preferred_element_type=jnp.float32)  # (Bb, S, hd)
            ctx_heads.append(ctx.reshape(M, hd))
        ctx = jnp.concatenate(ctx_heads, axis=-1)                 # (M, D)

        attn = jnp.dot(ctx.astype(jnp.bfloat16), wo_ref[...],
                       preferred_element_type=jnp.float32) + bo_ref[...]

        y = x + attn
        mu = jnp.mean(y, axis=-1, keepdims=True)
        var = jnp.mean((y - mu) ** 2, axis=-1, keepdims=True)
        y = (y - mu) * jax.lax.rsqrt(var + eps) * g1_ref[...] + be1_ref[...]
        y_ref[...] = y                          # f32 copy for the LN2 residual
        y16_ref[...] = y.astype(jnp.bfloat16)   # bf16 FFN LHS, cast ONCE
        acc_ref[...] = jnp.zeros_like(acc_ref)

    # ---- feed-forward (Linear -> ReLU -> Linear), streamed over FF tiles ----
    h1 = jnp.dot(y16_ref[...], w1_ref[...],
                 preferred_element_type=jnp.float32) + b1_ref[...]
    h1 = jnp.maximum(h1, 0.0)
    acc_ref[...] += jnp.dot(h1.astype(jnp.bfloat16), w2_ref[...],
                            preferred_element_type=jnp.float32)

    # ---- residual + LayerNorm2 + store (last FF tile) ----
    @pl.when(fi == pl.num_programs(1) - 1)
    def _ln2_store():
        z = y_ref[...] + acc_ref[...] + b2_ref[...]
        mu = jnp.mean(z, axis=-1, keepdims=True)
        var = jnp.mean((z - mu) ** 2, axis=-1, keepdims=True)
        z = (z - mu) * jax.lax.rsqrt(var + eps) * g2_ref[...] + be2_ref[...]
        # TODO(synk): lane-dense output view for D % 128 != 0 configs.
        o_ref[...] = z.reshape(Bb, S, D).astype(o_ref.dtype)


def _vmem_limit_bytes():
    """~3/4 of this generation's physical VMEM (96 MiB on v5e/v6e, 48 MiB on
    v7x); conservative 48 MiB fallback if the query is unavailable."""
    try:
        cap = int(pltpu.get_tpu_info().vmem_capacity_bytes)
    except Exception:
        cap = 64 * 1024 * 1024
    return max(32 * 1024 * 1024, (cap * 3) // 4)


def _pick_batch_block(batch, seq, target_rows=256):
    """Pick Bblk so the flattened M = Bblk*S approaches the MXU row target,
    while keeping >= 2 batch blocks when B >= 2 (feeds both v7x TensorCores)."""
    bb = max(1, min(batch, target_rows // max(seq, 1)))
    while bb > 1 and (batch % bb != 0 or batch // bb < 2):
        bb -= 1
    return bb


def multi_head_attention(x, params, *, nheads, eps=1e-5, tile_ff=512,
                         batch_block=None, single_buffer_constants=True):
    """params: dict of matmul-form weights (y = x @ W + b); matmul weights are
    bf16 (halves weight DMA), biases / LayerNorm params are f32."""
    B, S, D = x.shape
    assert D % nheads == 0
    head_dim = D // nheads
    FF = params["w1"].shape[1]

    vmem_limit = _vmem_limit_bytes()

    # Cap the streamed FFN tile so its double-buffered w1/w2 copies use at most
    # ~1/4 of the VMEM budget: bytes ~= 2 specs x 2 buffers x D x tile_ff x 2B.
    max_tile_ff = max(128, (((vmem_limit // 4) // (8 * D)) // 128) * 128)
    tile_ff = min(tile_ff, FF, max_tile_ff)
    if tile_ff <= 0 or FF % tile_ff != 0 or (tile_ff % 128 != 0 and tile_ff != FF):
        tile_ff = FF   # single full-width tile: always layout-legal
    n_ff = FF // tile_ff

    if batch_block is None:
        batch_block = _pick_batch_block(B, S)
    assert B % batch_block == 0
    nb = B // batch_block
    M = batch_block * S

    weight_order = ("wqkv", "bqkv", "wo", "bo", "g1", "be1",
                    "w1", "b1", "w2", "b2", "g2", "be2")
    weight_args = [params[n] for n in weight_order]

    kernel = functools.partial(encoder_layer_kernel,
                               nheads=nheads, head_dim=head_dim,
                               batch_block=batch_block, seq_len=S, eps=eps)

    # Cost estimate: streamed w1/b1/w2 are re-fetched once per batch block.
    flops = 2 * B * S * D * (4 * D + 2 * FF) + 4 * B * S * S * D
    streamed = ("w1", "b1", "w2")
    const_bytes = sum(int(params[n].size) * params[n].dtype.itemsize
                      for n in weight_order if n not in streamed)
    stream_bytes = nb * sum(int(params[n].size) * params[n].dtype.itemsize
                            for n in streamed)
    cost = pl.CostEstimate(
        flops=flops,
        transcendentals=B * nheads * S * S,
        bytes_accessed=(int(x.size) * x.dtype.itemsize            # x in
                        + B * S * D * x.dtype.itemsize            # out
                        + const_bytes + stream_bytes))

    def build(single_buf):
        def const_spec(shape):
            nd = len(shape)
            kw = {}
            if single_buf:
                # constant-index blocks are DMA'd once; one buffer is enough
                kw["pipeline_mode"] = pl.Buffered(1)
            return pl.BlockSpec(shape, lambda b, f, _nd=nd: (0,) * _nd, **kw)

        in_specs = [
            pl.BlockSpec((batch_block, S, D), lambda b, f: (b, 0, 0)),  # x
            const_spec((3, D, D)),                                      # wqkv
            const_spec((3, 1, D)),                                      # bqkv
            const_spec((D, D)),                                         # wo
            const_spec((1, D)),                                         # bo
            const_spec((1, D)),                                         # g1
            const_spec((1, D)),                                         # be1
            pl.BlockSpec((D, tile_ff), lambda b, f: (0, f)),            # w1 (streamed)
            pl.BlockSpec((1, tile_ff), lambda b, f: (0, f)),            # b1 (streamed)
            pl.BlockSpec((tile_ff, D), lambda b, f: (f, 0)),            # w2 (streamed)
            const_spec((1, D)),                                         # b2
            const_spec((1, D)),                                         # g2
            const_spec((1, D)),                                         # be2
        ]
        return pl.pallas_call(
            kernel,
            out_shape=jax.ShapeDtypeStruct((B, S, D), x.dtype),
            grid_spec=pltpu.PrefetchScalarGridSpec(
                num_scalar_prefetch=0,
                grid=(nb, n_ff),
                in_specs=in_specs,
                out_specs=pl.BlockSpec((batch_block, S, D), lambda b, f: (b, 0, 0)),
                scratch_shapes=[pltpu.VMEM((M, D), jnp.float32),    # y  (post-LN1, f32)
                                pltpu.VMEM((M, D), jnp.bfloat16),   # y  (post-LN1, bf16)
                                pltpu.VMEM((M, D), jnp.float32)]),  # FFN accumulator
            compiler_params=pltpu.CompilerParams(
                dimension_semantics=("parallel", "arbitrary"),
                vmem_limit_bytes=vmem_limit),
            cost_estimate=cost,
        )

    if single_buffer_constants:
        try:
            return jax.block_until_ready(build(True)(x, *weight_args))
        except Exception:
            # Fallback: this JAX/Mosaic build does not accept pipeline_mode on
            # top-level pallas_call BlockSpecs; use default double-buffering.
            pass
    return build(False)(x, *weight_args)


def reference(x, p, *, nheads, eps=1e-5):
    """Plain-JAX TransformerEncoderLayer forward (eval mode), mirroring the
    kernel's bf16-matmul / f32-accumulation numerics."""
    B, S, D = x.shape
    hd = D // nheads
    bf16, f32 = jnp.bfloat16, jnp.float32
    scale = 1.0 / math.sqrt(hd)

    def per_batch(xb):
        xb32 = xb.astype(f32)
        xb16 = xb32.astype(bf16)

        def proj(i):
            return jnp.dot(xb16, p["wqkv"][i],
                           preferred_element_type=f32) + p["bqkv"][i]
        q, k, v = proj(0), proj(1), proj(2)

        outs = []
        for h in range(nheads):
            sl = slice(h * hd, (h + 1) * hd)
            qh = (q[:, sl] * scale).astype(bf16)
            kh, vh = k[:, sl].astype(bf16), v[:, sl].astype(bf16)
            s = jnp.dot(qh, kh.T, preferred_element_type=f32)
            a = jax.nn.softmax(s, axis=-1)
            outs.append(jnp.dot(a.astype(bf16), vh, preferred_element_type=f32))
        ctx = jnp.concatenate(outs, axis=-1)

        attn = jnp.dot(ctx.astype(bf16), p["wo"],
                       preferred_element_type=f32) + p["bo"][0]
        y = xb32 + attn
        mu = y.mean(-1, keepdims=True)
        var = ((y - mu) ** 2).mean(-1, keepdims=True)
        y = (y - mu) * jax.lax.rsqrt(var + eps) * p["g1"][0] + p["be1"][0]

        h1 = jnp.maximum(jnp.dot(y.astype(bf16), p["w1"],
                                 preferred_element_type=f32) + p["b1"][0], 0.0)
        h2 = jnp.dot(h1.astype(bf16), p["w2"],
                     preferred_element_type=f32) + p["b2"][0]
        z = y + h2
        mu2 = z.mean(-1, keepdims=True)
        var2 = ((z - mu2) ** 2).mean(-1, keepdims=True)
        return (z - mu2) * jax.lax.rsqrt(var2 + eps) * p["g2"][0] + p["be2"][0]

    return jax.vmap(per_batch)(x)


if __name__ == "__main__":
    # Small shapes consistent with the module's forward: (batch, seq, d_model).
    B, S, D = 2, 8, 32
    NHEADS = 2
    FF = 2048  # torch.nn.TransformerEncoderLayer default dim_feedforward

    key = jax.random.PRNGKey(0)
    kx, *kw = jax.random.split(key, 9)

    def init(k, shape, fan_in):
        bound = 1.0 / math.sqrt(fan_in)
        return jax.random.uniform(k, shape, jnp.float32, -bound, bound)

    params = {
        # Q/K/V projection packed on a MAJOR dim (3, D, D); bf16 matmul weights
        "wqkv": init(kw[0], (3, D, D), D).astype(jnp.bfloat16),
        "bqkv": init(kw[1], (3, 1, D), D),
        "wo":   init(kw[2], (D, D), D).astype(jnp.bfloat16),
        "bo":   init(kw[3], (1, D), D),
        # LayerNorm 1 / 2
        "g1": jnp.ones((1, D), jnp.float32), "be1": jnp.zeros((1, D), jnp.float32),
        "g2": jnp.ones((1, D), jnp.float32), "be2": jnp.zeros((1, D), jnp.float32),
        # feed-forward
        "w1": init(kw[4], (D, FF), D).astype(jnp.bfloat16),
        "b1": init(kw[5], (1, FF), D),
        "w2": init(kw[6], (FF, D), FF).astype(jnp.bfloat16),
        "b2": init(kw[7], (1, D), FF),
    }

    x = jax.random.normal(kx, (B, S, D), jnp.float32)

    out = jax.block_until_ready(multi_head_attention(x, params, nheads=NHEADS))
    ref = jax.block_until_ready(reference(x, params, nheads=NHEADS))

    assert out.shape == (B, S, D)
    err = float(jnp.max(jnp.abs(out - ref)))
    # Only accumulation-order noise vs the bf16-mirrored reference remains
    # (exact softmax reciprocal now used in-kernel).
    assert jnp.allclose(out, ref, rtol=3e-3, atol=3e-3), f"max abs diff {err}"

    print("KERNEL_OK")
</pallas_src>

<mosaic_0001>
module attributes {stable_mosaic.version = 11 : i64} {
  func.func @encoder_layer_kernel(%arg0: i32, %arg1: i32, %arg2: memref<1x8x32xf32, #tpu.memory_space<vmem>>, %arg3: memref<3x32x32xbf16, #tpu.memory_space<vmem>>, %arg4: memref<3x1x32xf32, #tpu.memory_space<vmem>>, %arg5: memref<32x32xbf16, #tpu.memory_space<vmem>>, %arg6: memref<1x32xf32, #tpu.memory_space<vmem>>, %arg7: memref<1x32xf32, #tpu.memory_space<vmem>>, %arg8: memref<1x32xf32, #tpu.memory_space<vmem>>, %arg9: memref<32x512xbf16, #tpu.memory_space<vmem>>, %arg10: memref<1x512xf32, #tpu.memory_space<vmem>>, %arg11: memref<512x32xbf16, #tpu.memory_space<vmem>>, %arg12: memref<1x32xf32, #tpu.memory_space<vmem>>, %arg13: memref<1x32xf32, #tpu.memory_space<vmem>>, %arg14: memref<1x32xf32, #tpu.memory_space<vmem>>, %arg15: memref<1x8x32xf32, #tpu.memory_space<vmem>>, %arg16: memref<8x32xf32, #tpu.memory_space<vmem>>, %arg17: memref<8x32xbf16, #tpu.memory_space<vmem>>, %arg18: memref<8x32xf32, #tpu.memory_space<vmem>>) attributes {dimension_semantics = [#tpu.dimension_semantics<parallel>, #tpu.dimension_semantics<arbitrary>], iteration_bounds = array<i64: 2, 4>, scalar_prefetch = 0 : i64, scratch_operands = 3 : i64, tpu.core_type = #tpu.core_type<tc>, window_params = [{transform_indices = @transform_0, window_bounds = array<i64: 1, 8, 32>}, {pipeline_mode = #tpu.pipeline_mode<synchronous>, transform_indices = @transform_1, window_bounds = array<i64: 3, 32, 32>}, {pipeline_mode = #tpu.pipeline_mode<synchronous>, transform_indices = @transform_2, window_bounds = array<i64: 3, 1, 32>}, {pipeline_mode = #tpu.pipeline_mode<synchronous>, transform_indices = @transform_3, window_bounds = array<i64: 32, 32>}, {pipeline_mode = #tpu.pipeline_mode<synchronous>, transform_indices = @transform_4, window_bounds = array<i64: 1, 32>}, {pipeline_mode = #tpu.pipeline_mode<synchronous>, transform_indices = @transform_5, window_bounds = array<i64: 1, 32>}, {pipeline_mode = #tpu.pipeline_mode<synchronous>, transform_indices = @transform_6, window_bounds = array<i64: 1, 32>}, {transform_indices = @transform_7, window_bounds = array<i64: 32, 512>}, {transform_indices = @transform_8, window_bounds = array<i64: 1, 512>}, {transform_indices = @transform_9, window_bounds = array<i64: 512, 32>}, {pipeline_mode = #tpu.pipeline_mode<synchronous>, transform_indices = @transform_10, window_bounds = array<i64: 1, 32>}, {pipeline_mode = #tpu.pipeline_mode<synchronous>, transform_indices = @transform_11, window_bounds = array<i64: 1, 32>}, {pipeline_mode = #tpu.pipeline_mode<synchronous>, transform_indices = @transform_12, window_bounds = array<i64: 1, 32>}, {transform_indices = @transform_13, window_bounds = array<i64: 1, 8, 32>}]} {
    %c0_i32 = arith.constant 0 : i32
    %0 = arith.cmpi eq, %arg1, %c0_i32 : i32
    %1 = arith.extui %0 : i1 to i32
    %c0_i32_0 = arith.constant 0 : i32
    %2 = arith.cmpi ne, %1, %c0_i32_0 : i32
    scf.if %2 {
      %c0_15 = arith.constant 0 : index
      %c0_16 = arith.constant 0 : index
      %c0_17 = arith.constant 0 : index
      %20 = vector.load %arg2[%c0_15, %c0_16, %c0_17] : memref<1x8x32xf32, #tpu.memory_space<vmem>>, vector<1x8x32xf32>
      %21 = vector.shape_cast %20 : vector<1x8x32xf32> to vector<8x32xf32>
      %22 = arith.truncf %21 : vector<8x32xf32> to vector<8x32xbf16>
      %c0_18 = arith.constant 0 : index
      %c0_19 = arith.constant 0 : index
      %c0_20 = arith.constant 0 : index
      %23 = vector.load %arg3[%c0_18, %c0_19, %c0_20] : memref<3x32x32xbf16, #tpu.memory_space<vmem>>, vector<1x32x32xbf16>
      %24 = vector.shape_cast %23 : vector<1x32x32xbf16> to vector<32x32xbf16>
      %cst_21 = arith.constant dense<0.000000e+00> : vector<8x32xf32>
      %25 = tpu.matmul %22, %24, %cst_21 {dimension_numbers = #tpu.dot_dimension_numbers<[1], [0], [0], [1], [0, 0, 1, 1], [], []>} : vector<8x32xbf16>, vector<32x32xbf16>, vector<8x32xf32> -> vector<8x32xf32>
      %c0_22 = arith.constant 0 : index
      %c0_23 = arith.constant 0 : index
      %c0_24 = arith.constant 0 : index
      %26 = vector.load %arg4[%c0_22, %c0_23, %c0_24] : memref<3x1x32xf32, #tpu.memory_space<vmem>>, vector<1x1x32xf32>
      %27 = vector.shape_cast %26 : vector<1x1x32xf32> to vector<1x32xf32>
      %28 = vector.broadcast %27 : vector<1x32xf32> to vector<8x32xf32>
      %29 = arith.addf %25, %28 : vector<8x32xf32>
      %c1 = arith.constant 1 : index
      %c0_25 = arith.constant 0 : index
      %c0_26 = arith.constant 0 : index
      %30 = vector.load %arg3[%c1, %c0_25, %c0_26] : memref<3x32x32xbf16, #tpu.memory_space<vmem>>, vector<1x32x32xbf16>
      %31 = vector.shape_cast %30 : vector<1x32x32xbf16> to vector<32x32xbf16>
      %cst_27 = arith.constant dense<0.000000e+00> : vector<8x32xf32>
      %32 = tpu.matmul %22, %31, %cst_27 {dimension_numbers = #tpu.dot_dimension_numbers<[1], [0], [0], [1], [0, 0, 1, 1], [], []>} : vector<8x32xbf16>, vector<32x32xbf16>, vector<8x32xf32> -> vector<8x32xf32>
      %c1_28 = arith.constant 1 : index
      %c0_29 = arith.constant 0 : index
      %c0_30 = arith.constant 0 : index
      %33 = vector.load %arg4[%c1_28, %c0_29, %c0_30] : memref<3x1x32xf32, #tpu.memory_space<vmem>>, vector<1x1x32xf32>
      %34 = vector.shape_cast %33 : vector<1x1x32xf32> to vector<1x32xf32>
      %35 = vector.broadcast %34 : vector<1x32xf32> to vector<8x32xf32>
      %36 = arith.addf %32, %35 : vector<8x32xf32>
      %c2 = arith.constant 2 : index
      %c0_31 = arith.constant 0 : index
      %c0_32 = arith.constant 0 : index
      %37 = vector.load %arg3[%c2, %c0_31, %c0_32] : memref<3x32x32xbf16, #tpu.memory_space<vmem>>, vector<1x32x32xbf16>
      %38 = vector.shape_cast %37 : vector<1x32x32xbf16> to vector<32x32xbf16>
      %cst_33 = arith.constant dense<0.000000e+00> : vector<8x32xf32>
      %39 = tpu.matmul %22, %38, %cst_33 {dimension_numbers = #tpu.dot_dimension_numbers<[1], [0], [0], [1], [0, 0, 1, 1], [], []>} : vector<8x32xbf16>, vector<32x32xbf16>, vector<8x32xf32> -> vector<8x32xf32>
      %c2_34 = arith.constant 2 : index
      %c0_35 = arith.constant 0 : index
      %c0_36 = arith.constant 0 : index
      %40 = vector.load %arg4[%c2_34, %c0_35, %c0_36] : memref<3x1x32xf32, #tpu.memory_space<vmem>>, vector<1x1x32xf32>
      %41 = vector.shape_cast %40 : vector<1x1x32xf32> to vector<1x32xf32>
      %42 = vector.broadcast %41 : vector<1x32xf32> to vector<8x32xf32>
      %43 = arith.addf %39, %42 : vector<8x32xf32>
      %44 = vector.extract_strided_slice %29 {offsets = [0, 0], sizes = [8, 16], strides = [1, 1]} : vector<8x32xf32> to vector<8x16xf32>
      %cst_37 = arith.constant 2.500000e-01 : f32
      %45 = vector.broadcast %cst_37 : f32 to vector<8x16xf32>
      %46 = arith.mulf %44, %45 : vector<8x16xf32>
      %47 = arith.truncf %46 : vector<8x16xf32> to vector<8x16xbf16>
      %48 = vector.shape_cast %47 : vector<8x16xbf16> to vector<1x8x16xbf16>
      %49 = vector.extract_strided_slice %36 {offsets = [0, 0], sizes = [8, 16], strides = [1, 1]} : vector<8x32xf32> to vector<8x16xf32>
      %50 = arith.truncf %49 : vector<8x16xf32> to vector<8x16xbf16>
      %51 = vector.shape_cast %50 : vector<8x16xbf16> to vector<1x8x16xbf16>
      %52 = vector.extract_strided_slice %43 {offsets = [0, 0], sizes = [8, 16], strides = [1, 1]} : vector<8x32xf32> to vector<8x16xf32>
      %53 = arith.truncf %52 : vector<8x16xf32> to vector<8x16xbf16>
      %54 = vector.shape_cast %53 : vector<8x16xbf16> to vector<1x8x16xbf16>
      "tpu.trace_start"() <{level = 10 : i32, message = "bqd,bkd->bqk"}> : () -> ()
      %cst_38 = arith.constant dense<0.000000e+00> : vector<1x8x8xf32>
      %55 = tpu.matmul %48, %51, %cst_38 {dimension_numbers = #tpu.dot_dimension_numbers<[2], [2], [1], [1], [0, 0, 0, 1, 1, 1], [0], [0]>} : vector<1x8x16xbf16>, vector<1x8x16xbf16>, vector<1x8x8xf32> -> vector<1x8x8xf32>
      "tpu.trace_stop"() : () -> ()
      %cst_39 = arith.constant dense<0xFF800000> : vector<1x8xf32>
      %56 = vector.multi_reduction <maximumf>, %55, %cst_39 [2] : vector<1x8x8xf32> to vector<1x8xf32>
      %57 = vector.shape_cast %56 : vector<1x8xf32> to vector<1x8x1xf32>
      %58 = vector.broadcast %57 : vector<1x8x1xf32> to vector<1x8x8xf32>
      %59 = arith.subf %55, %58 : vector<1x8x8xf32>
      %60 = math.exp %59 : vector<1x8x8xf32>
      %cst_40 = arith.constant dense<0.000000e+00> : vector<1x8xf32>
      %61 = vector.multi_reduction <add>, %60, %cst_40 [2] : vector<1x8x8xf32> to vector<1x8xf32>
      %62 = vector.shape_cast %61 : vector<1x8xf32> to vector<1x8x1xf32>
      %63 = tpu.reciprocal %62 : vector<1x8x1xf32> -> vector<1x8x1xf32>
      %64 = vector.broadcast %63 : vector<1x8x1xf32> to vector<1x8x8xf32>
      %65 = arith.mulf %60, %64 : vector<1x8x8xf32>
      %66 = arith.truncf %65 : vector<1x8x8xf32> to vector<1x8x8xbf16>
      "tpu.trace_start"() <{level = 10 : i32, message = "bqk,bkd->bqd"}> : () -> ()
      %cst_41 = arith.constant dense<0.000000e+00> : vector<1x8x16xf32>
      %67 = tpu.matmul %66, %54, %cst_41 {dimension_numbers = #tpu.dot_dimension_numbers<[2], [1], [1], [2], [0, 0, 0, 1, 1, 2], [0], [0]>} : vector<1x8x8xbf16>, vector<1x8x16xbf16>, vector<1x8x16xf32> -> vector<1x8x16xf32>
      "tpu.trace_stop"() : () -> ()
      %68 = vector.shape_cast %67 : vector<1x8x16xf32> to vector<8x16xf32>
      %69 = vector.extract_strided_slice %29 {offsets = [0, 16], sizes = [8, 16], strides = [1, 1]} : vector<8x32xf32> to vector<8x16xf32>
      %cst_42 = arith.constant 2.500000e-01 : f32
      %70 = vector.broadcast %cst_42 : f32 to vector<8x16xf32>
      %71 = arith.mulf %69, %70 : vector<8x16xf32>
      %72 = arith.truncf %71 : vector<8x16xf32> to vector<8x16xbf16>
      %73 = vector.shape_cast %72 : vector<8x16xbf16> to vector<1x8x16xbf16>
      %74 = vector.extract_strided_slice %36 {offsets = [0, 16], sizes = [8, 16], strides = [1, 1]} : vector<8x32xf32> to vector<8x16xf32>
      %75 = arith.truncf %74 : vector<8x16xf32> to vector<8x16xbf16>
      %76 = vector.shape_cast %75 : vector<8x16xbf16> to vector<1x8x16xbf16>
      %77 = vector.extract_strided_slice %43 {offsets = [0, 16], sizes = [8, 16], strides = [1, 1]} : vector<8x32xf32> to vector<8x16xf32>
      %78 = arith.truncf %77 : vector<8x16xf32> to vector<8x16xbf16>
      %79 = vector.shape_cast %78 : vector<8x16xbf16> to vector<1x8x16xbf16>
      "tpu.trace_start"() <{level = 10 : i32, message = "bqd,bkd->bqk"}> : () -> ()
      %cst_43 = arith.constant dense<0.000000e+00> : vector<1x8x8xf32>
      %80 = tpu.matmul %73, %76, %cst_43 {dimension_numbers = #tpu.dot_dimension_numbers<[2], [2], [1], [1], [0, 0, 0, 1, 1, 1], [0], [0]>} : vector<1x8x16xbf16>, vector<1x8x16xbf16>, vector<1x8x8xf32> -> vector<1x8x8xf32>
      "tpu.trace_stop"() : () -> ()
      %cst_44 = arith.constant dense<0xFF800000> : vector<1x8xf32>
      %81 = vector.multi_reduction <maximumf>, %80, %cst_44 [2] : vector<1x8x8xf32> to vector<1x8xf32>
      %82 = vector.shape_cast %81 : vector<1x8xf32> to vector<1x8x1xf32>
      %83 = vector.broadcast %82 : vector<1x8x1xf32> to vector<1x8x8xf32>
      %84 = arith.subf %80, %83 : vector<1x8x8xf32>
      %85 = math.exp %84 : vector<1x8x8xf32>
      %cst_45 = arith.constant dense<0.000000e+00> : vector<1x8xf32>
      %86 = vector.multi_reduction <add>, %85, %cst_45 [2] : vector<1x8x8xf32> to vector<1x8xf32>
      %87 = vector.shape_cast %86 : vector<1x8xf32> to vector<1x8x1xf32>
      %88 = tpu.reciprocal %87 : vector<1x8x1xf32> -> vector<1x8x1xf32>
      %89 = vector.broadcast %88 : vector<1x8x1xf32> to vector<1x8x8xf32>
      %90 = arith.mulf %85, %89 : vector<1x8x8xf32>
      %91 = arith.truncf %90 : vector<1x8x8xf32> to vector<1x8x8xbf16>
      "tpu.trace_start"() <{level = 10 : i32, message = "bqk,bkd->bqd"}> : () -> ()
      %cst_46 = arith.constant dense<0.000000e+00> : vector<1x8x16xf32>
      %92 = tpu.matmul %91, %79, %cst_46 {dimension_numbers = #tpu.dot_dimension_numbers<[2], [1], [1], [2], [0, 0, 0, 1, 1, 2], [0], [0]>} : vector<1x8x8xbf16>, vector<1x8x16xbf16>, vector<1x8x16xf32> -> vector<1x8x16xf32>
      "tpu.trace_stop"() : () -> ()
      %93 = vector.shape_cast %92 : vector<1x8x16xf32> to vector<8x16xf32>
      %94 = tpu.concatenate %68, %93 in 1 : vector<8x16xf32>, vector<8x16xf32> -> vector<8x32xf32>
      %95 = arith.truncf %94 : vector<8x32xf32> to vector<8x32xbf16>
      %c0_47 = arith.constant 0 : index
      %c0_48 = arith.constant 0 : index
      %96 = vector.load %arg5[%c0_47, %c0_48] : memref<32x32xbf16, #tpu.memory_space<vmem>>, vector<32x32xbf16>
      %cst_49 = arith.constant dense<0.000000e+00> : vector<8x32xf32>
      %97 = tpu.matmul %95, %96, %cst_49 {dimension_numbers = #tpu.dot_dimension_numbers<[1], [0], [0], [1], [0, 0, 1, 1], [], []>} : vector<8x32xbf16>, vector<32x32xbf16>, vector<8x32xf32> -> vector<8x32xf32>
      %c0_50 = arith.constant 0 : index
      %c0_51 = arith.constant 0 : index
      %98 = vector.load %arg6[%c0_50, %c0_51] : memref<1x32xf32, #tpu.memory_space<vmem>>, vector<1x32xf32>
      %99 = vector.broadcast %98 : vector<1x32xf32> to vector<8x32xf32>
      %100 = arith.addf %97, %99 : vector<8x32xf32>
      %101 = arith.addf %21, %100 : vector<8x32xf32>
      %cst_52 = arith.constant dense<0.000000e+00> : vector<8xf32>
      %102 = vector.multi_reduction <add>, %101, %cst_52 [1] : vector<8x32xf32> to vector<8xf32>
      %103 = vector.shape_cast %102 : vector<8xf32> to vector<8x1xf32>
      %cst_53 = arith.constant 3.200000e+01 : f32
      %104 = vector.broadcast %cst_53 : f32 to vector<8x1xf32>
      %105 = arith.divf %103, %104 : vector<8x1xf32>
      %106 = vector.broadcast %105 : vector<8x1xf32> to vector<8x32xf32>
      %107 = arith.subf %101, %106 : vector<8x32xf32>
      %108 = arith.mulf %107, %107 : vector<8x32xf32>
      %cst_54 = arith.constant dense<0.000000e+00> : vector<8xf32>
      %109 = vector.multi_reduction <add>, %108, %cst_54 [1] : vector<8x32xf32> to vector<8xf32>
      %110 = vector.shape_cast %109 : vector<8xf32> to vector<8x1xf32>
      %cst_55 = arith.constant 3.200000e+01 : f32
      %111 = vector.broadcast %cst_55 : f32 to vector<8x1xf32>
      %112 = arith.divf %110, %111 : vector<8x1xf32>
      %113 = vector.broadcast %105 : vector<8x1xf32> to vector<8x32xf32>
      %114 = arith.subf %101, %113 : vector<8x32xf32>
      %cst_56 = arith.constant 9.99999974E-6 : f32
      %115 = vector.broadcast %cst_56 : f32 to vector<8x1xf32>
      %116 = arith.addf %112, %115 : vector<8x1xf32>
      %117 = math.rsqrt %116 : vector<8x1xf32>
      %118 = vector.broadcast %117 : vector<8x1xf32> to vector<8x32xf32>
      %119 = arith.mulf %114, %118 : vector<8x32xf32>
      %c0_57 = arith.constant 0 : index
      %c0_58 = arith.constant 0 : index
      %120 = vector.load %arg7[%c0_57, %c0_58] : memref<1x32xf32, #tpu.memory_space<vmem>>, vector<1x32xf32>
      %121 = vector.broadcast %120 : vector<1x32xf32> to vector<8x32xf32>
      %122 = arith.mulf %119, %121 : vector<8x32xf32>
      %c0_59 = arith.constant 0 : index
      %c0_60 = arith.constant 0 : index
      %123 = vector.load %arg8[%c0_59, %c0_60] : memref<1x32xf32, #tpu.memory_space<vmem>>, vector<1x32xf32>
      %124 = vector.broadcast %123 : vector<1x32xf32> to vector<8x32xf32>
      %125 = arith.addf %122, %124 : vector<8x32xf32>
      %c0_61 = arith.constant 0 : index
      %c0_62 = arith.constant 0 : index
      %126 = vector.load %arg16[%c0_61, %c0_62] : memref<8x32xf32, #tpu.memory_space<vmem>>, vector<8x32xf32>
      tpu.vector_store %arg16[%c0_61, %c0_62], %125 {strides = array<i32>} : memref<8x32xf32, #tpu.memory_space<vmem>>, vector<8x32xf32>,
      %127 = arith.truncf %125 : vector<8x32xf32> to vector<8x32xbf16>
      %c0_63 = arith.constant 0 : index
      %c0_64 = arith.constant 0 : index
      %128 = vector.load %arg17[%c0_63, %c0_64] : memref<8x32xbf16, #tpu.memory_space<vmem>>, vector<8x32xbf16>
      tpu.vector_store %arg17[%c0_63, %c0_64], %127 {strides = array<i32>} : memref<8x32xbf16, #tpu.memory_space<vmem>>, vector<8x32xbf16>,
      %cst_65 = arith.constant 0.000000e+00 : f32
      %129 = vector.broadcast %cst_65 : f32 to vector<8x32xf32>
      %c0_66 = arith.constant 0 : index
      %c0_67 = arith.constant 0 : index
      %130 = vector.load %arg18[%c0_66, %c0_67] : memref<8x32xf32, #tpu.memory_space<vmem>>, vector<8x32xf32>
      tpu.vector_store %arg18[%c0_66, %c0_67], %129 {strides = array<i32>} : memref<8x32xf32, #tpu.memory_space<vmem>>, vector<8x32xf32>,
    } else {
    }
    %c0 = arith.constant 0 : index
    %c0_1 = arith.constant 0 : index
    %3 = vector.load %arg17[%c0, %c0_1] : memref<8x32xbf16, #tpu.memory_space<vmem>>, vector<8x32xbf16>
    %c0_2 = arith.constant 0 : index
    %c0_3 = arith.constant 0 : index
    %4 = vector.load %arg9[%c0_2, %c0_3] : memref<32x512xbf16, #tpu.memory_space<vmem>>, vector<32x512xbf16>
    %cst = arith.constant dense<0.000000e+00> : vector<8x512xf32>
    %5 = tpu.matmul %3, %4, %cst {dimension_numbers = #tpu.dot_dimension_numbers<[1], [0], [0], [1], [0, 0, 1, 1], [], []>} : vector<8x32xbf16>, vector<32x512xbf16>, vector<8x512xf32> -> vector<8x512xf32>
    %c0_4 = arith.constant 0 : index
    %c0_5 = arith.constant 0 : index
    %6 = vector.load %arg10[%c0_4, %c0_5] : memref<1x512xf32, #tpu.memory_space<vmem>>, vector<1x512xf32>
    %7 = vector.broadcast %6 : vector<1x512xf32> to vector<8x512xf32>
    %8 = arith.addf %5, %7 : vector<8x512xf32>
    %cst_6 = arith.constant 0.000000e+00 : f32
    %9 = vector.broadcast %cst_6 : f32 to vector<8x512xf32>
    %10 = arith.maximumf %8, %9 : vector<8x512xf32>
    %c0_7 = arith.constant 0 : index
    %c0_8 = arith.constant 0 : index
    %11 = vector.load %arg18[%c0_7, %c0_8] : memref<8x32xf32, #tpu.memory_space<vmem>>, vector<8x32xf32>
    %12 = arith.truncf %10 : vector<8x512xf32> to vector<8x512xbf16>
    %c0_9 = arith.constant 0 : index
    %c0_10 = arith.constant 0 : index
    %13 = vector.load %arg11[%c0_9, %c0_10] : memref<512x32xbf16, #tpu.memory_space<vmem>>, vector<512x32xbf16>
    %cst_11 = arith.constant dense<0.000000e+00> : vector<8x32xf32>
    %14 = tpu.matmul %12, %13, %cst_11 {dimension_numbers = #tpu.dot_dimension_numbers<[1], [0], [0], [1], [0, 0, 1, 1], [], []>} : vector<8x512xbf16>, vector<512x32xbf16>, vector<8x32xf32> -> vector<8x32xf32>
    %15 = arith.addf %11, %14 : vector<8x32xf32>
    %c0_12 = arith.constant 0 : index
    %c0_13 = arith.constant 0 : index
    %16 = vector.load %arg18[%c0_12, %c0_13] : memref<8x32xf32, #tpu.memory_space<vmem>>, vector<8x32xf32>
    tpu.vector_store %arg18[%c0_12, %c0_13], %15 {strides = array<i32>} : memref<8x32xf32, #tpu.memory_space<vmem>>, vector<8x32xf32>,
    %c3_i32 = arith.constant 3 : i32
    %17 = arith.cmpi eq, %arg1, %c3_i32 : i32
    %18 = arith.extui %17 : i1 to i32
    %c0_i32_14 = arith.constant 0 : i32
    %19 = arith.cmpi ne, %18, %c0_i32_14 : i32
    scf.if %19 {
      %c0_15 = arith.constant 0 : index
      %c0_16 = arith.constant 0 : index
      %20 = vector.load %arg16[%c0_15, %c0_16] : memref<8x32xf32, #tpu.memory_space<vmem>>, vector<8x32xf32>
      %c0_17 = arith.constant 0 : index
      %c0_18 = arith.constant 0 : index
      %21 = vector.load %arg18[%c0_17, %c0_18] : memref<8x32xf32, #tpu.memory_space<vmem>>, vector<8x32xf32>
      %22 = arith.addf %20, %21 : vector<8x32xf32>
      %c0_19 = arith.constant 0 : index
      %c0_20 = arith.constant 0 : index
      %23 = vector.load %arg12[%c0_19, %c0_20] : memref<1x32xf32, #tpu.memory_space<vmem>>, vector<1x32xf32>
      %24 = vector.broadcast %23 : vector<1x32xf32> to vector<8x32xf32>
      %25 = arith.addf %22, %24 : vector<8x32xf32>
      %cst_21 = arith.constant dense<0.000000e+00> : vector<8xf32>
      %26 = vector.multi_reduction <add>, %25, %cst_21 [1] : vector<8x32xf32> to vector<8xf32>
      %27 = vector.shape_cast %26 : vector<8xf32> to vector<8x1xf32>
      %cst_22 = arith.constant 3.200000e+01 : f32
      %28 = vector.broadcast %cst_22 : f32 to vector<8x1xf32>
      %29 = arith.divf %27, %28 : vector<8x1xf32>
      %30 = vector.broadcast %29 : vector<8x1xf32> to vector<8x32xf32>
      %31 = arith.subf %25, %30 : vector<8x32xf32>
      %32 = arith.mulf %31, %31 : vector<8x32xf32>
      %cst_23 = arith.constant dense<0.000000e+00> : vector<8xf32>
      %33 = vector.multi_reduction <add>, %32, %cst_23 [1] : vector<8x32xf32> to vector<8xf32>
      %34 = vector.shape_cast %33 : vector<8xf32> to vector<8x1xf32>
      %cst_24 = arith.constant 3.200000e+01 : f32
      %35 = vector.broadcast %cst_24 : f32 to vector<8x1xf32>
      %36 = arith.divf %34, %35 : vector<8x1xf32>
      %37 = vector.broadcast %29 : vector<8x1xf32> to vector<8x32xf32>
      %38 = arith.subf %25, %37 : vector<8x32xf32>
      %cst_25 = arith.constant 9.99999974E-6 : f32
      %39 = vector.broadcast %cst_25 : f32 to vector<8x1xf32>
      %40 = arith.addf %36, %39 : vector<8x1xf32>
      %41 = math.rsqrt %40 : vector<8x1xf32>
      %42 = vector.broadcast %41 : vector<8x1xf32> to vector<8x32xf32>
      %43 = arith.mulf %38, %42 : vector<8x32xf32>
      %c0_26 = arith.constant 0 : index
      %c0_27 = arith.constant 0 : index
      %44 = vector.load %arg13[%c0_26, %c0_27] : memref<1x32xf32, #tpu.memory_space<vmem>>, vector<1x32xf32>
      %45 = vector.broadcast %44 : vector<1x32xf32> to vector<8x32xf32>
      %46 = arith.mulf %43, %45 : vector<8x32xf32>
      %c0_28 = arith.constant 0 : index
      %c0_29 = arith.constant 0 : index
      %47 = vector.load %arg14[%c0_28, %c0_29] : memref<1x32xf32, #tpu.memory_space<vmem>>, vector<1x32xf32>
      %48 = vector.broadcast %47 : vector<1x32xf32> to vector<8x32xf32>
      %49 = arith.addf %46, %48 : vector<8x32xf32>
      %50 = vector.shape_cast %49 : vector<8x32xf32> to vector<1x8x32xf32>
      %c0_30 = arith.constant 0 : index
      %c0_31 = arith.constant 0 : index
      %c0_32 = arith.constant 0 : index
      %51 = vector.load %arg15[%c0_30, %c0_31, %c0_32] : memref<1x8x32xf32, #tpu.memory_space<vmem>>, vector<1x8x32xf32>
      tpu.vector_store %arg15[%c0_30, %c0_31, %c0_32], %50 {strides = array<i32>} : memref<1x8x32xf32, #tpu.memory_space<vmem>>, vector<1x8x32xf32>,
    } else {
    }
    return
  }
  func.func @transform_0(%arg0: i32, %arg1: i32) -> (i32, i32, i32) {
    %c0_i32 = arith.constant 0 : i32
    %c0_i32_0 = arith.constant 0 : i32
    %c0_i32_1 = arith.constant 0 : i32
    return %arg0, %c0_i32, %c0_i32_0 : i32, i32, i32
  }
  func.func @transform_1(%arg0: i32, %arg1: i32) -> (i32, i32, i32) {
    %c0_i32 = arith.constant 0 : i32
    %c0_i32_0 = arith.constant 0 : i32
    %c0_i32_1 = arith.constant 0 : i32
    %c0_i32_2 = arith.constant 0 : i32
    return %c0_i32, %c0_i32_0, %c0_i32_1 : i32, i32, i32
  }
  func.func @transform_2(%arg0: i32, %arg1: i32) -> (i32, i32, i32) {
    %c0_i32 = arith.constant 0 : i32
    %c0_i32_0 = arith.constant 0 : i32
    %c0_i32_1 = arith.constant 0 : i32
    %c0_i32_2 = arith.constant 0 : i32
    return %c0_i32, %c0_i32_0, %c0_i32_1 : i32, i32, i32
  }
  func.func @transform_3(%arg0: i32, %arg1: i32) -> (i32, i32) {
    %c0_i32 = arith.constant 0 : i32
    %c0_i32_0 = arith.constant 0 : i32
    %c0_i32_1 = arith.constant 0 : i32
    return %c0_i32, %c0_i32_0 : i32, i32
  }
  func.func @transform_4(%arg0: i32, %arg1: i32) -> (i32, i32) {
    %c0_i32 = arith.constant 0 : i32
    %c0_i32_0 = arith.constant 0 : i32
    %c0_i32_1 = arith.constant 0 : i32
    return %c0_i32, %c0_i32_0 : i32, i32
  }
  func.func @transform_5(%arg0: i32, %arg1: i32) -> (i32, i32) {
    %c0_i32 = arith.constant 0 : i32
    %c0_i32_0 = arith.constant 0 : i32
    %c0_i32_1 = arith.constant 0 : i32
    return %c0_i32, %c0_i32_0 : i32, i32
  }
  func.func @transform_6(%arg0: i32, %arg1: i32) -> (i32, i32) {
    %c0_i32 = arith.constant 0 : i32
    %c0_i32_0 = arith.constant 0 : i32
    %c0_i32_1 = arith.constant 0 : i32
    return %c0_i32, %c0_i32_0 : i32, i32
  }
  func.func @transform_7(%arg0: i32, %arg1: i32) -> (i32, i32) {
    %c0_i32 = arith.constant 0 : i32
    %c0_i32_0 = arith.constant 0 : i32
    return %c0_i32, %arg1 : i32, i32
  }
  func.func @transform_8(%arg0: i32, %arg1: i32) -> (i32, i32) {
    %c0_i32 = arith.constant 0 : i32
    %c0_i32_0 = arith.constant 0 : i32
    return %c0_i32, %arg1 : i32, i32
  }
  func.func @transform_9(%arg0: i32, %arg1: i32) -> (i32, i32) {
    %c0_i32 = arith.constant 0 : i32
    %c0_i32_0 = arith.constant 0 : i32
    return %arg1, %c0_i32 : i32, i32
  }
  func.func @transform_10(%arg0: i32, %arg1: i32) -> (i32, i32) {
    %c0_i32 = arith.constant 0 : i32
    %c0_i32_0 = arith.constant 0 : i32
    %c0_i32_1 = arith.constant 0 : i32
    return %c0_i32, %c0_i32_0 : i32, i32
  }
  func.func @transform_11(%arg0: i32, %arg1: i32) -> (i32, i32) {
    %c0_i32 = arith.constant 0 : i32
    %c0_i32_0 = arith.constant 0 : i32
    %c0_i32_1 = arith.constant 0 : i32
    return %c0_i32, %c0_i32_0 : i32, i32
  }
  func.func @transform_12(%arg0: i32, %arg1: i32) -> (i32, i32) {
    %c0_i32 = arith.constant 0 : i32
    %c0_i32_0 = arith.constant 0 : i32
    %c0_i32_1 = arith.constant 0 : i32
    return %c0_i32, %c0_i32_0 : i32, i32
  }
  func.func @transform_13(%arg0: i32, %arg1: i32) -> (i32, i32, i32) {
    %c0_i32 = arith.constant 0 : i32
    %c0_i32_0 = arith.constant 0 : i32
    %c0_i32_1 = arith.constant 0 : i32
    return %arg0, %c0_i32, %c0_i32_0 : i32, i32, i32
  }
}

module attributes {stable_mosaic.version = 11 : i64} {
  func.func @encoder_layer_kernel(%arg0: i32, %arg1: i32, %arg2: memref<1x8x32xf32, #tpu.memory_space<vmem>>, %arg3: memref<3x32x32xbf16, #tpu.memory_space<vmem>>, %arg4: memref<3x1x32xf32, #tpu.memory_space<vmem>>, %arg5: memref<32x32xbf16, #tpu.memory_space<vmem>>, %arg6: memref<1x32xf32, #tpu.memory_space<vmem>>, %arg7: memref<1x32xf32, #tpu.memory_space<vmem>>, %arg8: memref<1x32xf32, #tpu.memory_space<vmem>>, %arg9: memref<32x512xbf16, #tpu.memory_space<vmem>>, %arg10: memref<1x512xf32, #tpu.memory_space<vmem>>, %arg11: memref<512x32xbf16, #tpu.memory_space<vmem>>, %arg12: memref<1x32xf32, #tpu.memory_space<vmem>>, %arg13: memref<1x32xf32, #tpu.memory_space<vmem>>, %arg14: memref<1x32xf32, #tpu.memory_space<vmem>>, %arg15: memref<1x8x32xf32, #tpu.memory_space<vmem>>, %arg16: memref<8x32xf32, #tpu.memory_space<vmem>>, %arg17: memref<8x32xbf16, #tpu.memory_space<vmem>>, %arg18: memref<8x32xf32, #tpu.memory_space<vmem>>) attributes {dimension_semantics = [#tpu.dimension_semantics<parallel>, #tpu.dimension_semantics<arbitrary>], iteration_bounds = array<i64: 2, 4>, scalar_prefetch = 0 : i64, scratch_operands = 3 : i64, tpu.core_type = #tpu.core_type<tc>, window_params = [{transform_indices = @transform_0, window_bounds = array<i64: 1, 8, 32>}, {pipeline_mode = #tpu.pipeline_mode<synchronous>, transform_indices = @transform_1, window_bounds = array<i64: 3, 32, 32>}, {pipeline_mode = #tpu.pipeline_mode<synchronous>, transform_indices = @transform_2, window_bounds = array<i64: 3, 1, 32>}, {pipeline_mode = #tpu.pipeline_mode<synchronous>, transform_indices = @transform_3, window_bounds = array<i64: 32, 32>}, {pipeline_mode = #tpu.pipeline_mode<synchronous>, transform_indices = @transform_4, window_bounds = array<i64: 1, 32>}, {pipeline_mode = #tpu.pipeline_mode<synchronous>, transform_indices = @transform_5, window_bounds = array<i64: 1, 32>}, {pipeline_mode = #tpu.pipeline_mode<synchronous>, transform_indices = @transform_6, window_bounds = array<i64: 1, 32>}, {transform_indices = @transform_7, window_bounds = array<i64: 32, 512>}, {transform_indices = @transform_8, window_bounds = array<i64: 1, 512>}, {transform_indices = @transform_9, window_bounds = array<i64: 512, 32>}, {pipeline_mode = #tpu.pipeline_mode<synchronous>, transform_indices = @transform_10, window_bounds = array<i64: 1, 32>}, {pipeline_mode = #tpu.pipeline_mode<synchronous>, transform_indices = @transform_11, window_bounds = array<i64: 1, 32>}, {pipeline_mode = #tpu.pipeline_mode<synchronous>, transform_indices = @transform_12, window_bounds = array<i64: 1, 32>}, {transform_indices = @transform_13, window_bounds = array<i64: 1, 8, 32>}]} {
    %c0_i32 = arith.constant 0 : i32
    %0 = arith.cmpi eq, %arg1, %c0_i32 : i32
    %1 = arith.extui %0 : i1 to i32
    %c0_i32_0 = arith.constant 0 : i32
    %2 = arith.cmpi ne, %1, %c0_i32_0 : i32
    scf.if %2 {
      %c0_15 = arith.constant 0 : index
      %c0_16 = arith.constant 0 : index
      %c0_17 = arith.constant 0 : index
      %20 = vector.load %arg2[%c0_15, %c0_16, %c0_17] : memref<1x8x32xf32, #tpu.memory_space<vmem>>, vector<1x8x32xf32>
      %21 = vector.shape_cast %20 : vector<1x8x32xf32> to vector<8x32xf32>
      %22 = arith.truncf %21 : vector<8x32xf32> to vector<8x32xbf16>
      %c0_18 = arith.constant 0 : index
      %c0_19 = arith.constant 0 : index
      %c0_20 = arith.constant 0 : index
      %23 = vector.load %arg3[%c0_18, %c0_19, %c0_20] : memref<3x32x32xbf16, #tpu.memory_space<vmem>>, vector<1x32x32xbf16>
      %24 = vector.shape_cast %23 : vector<1x32x32xbf16> to vector<32x32xbf16>
      %cst_21 = arith.constant dense<0.000000e+00> : vector<8x32xf32>
      %25 = tpu.matmul %22, %24, %cst_21 {dimension_numbers = #tpu.dot_dimension_numbers<[1], [0], [0], [1], [0, 0, 1, 1], [], []>} : vector<8x32xbf16>, vector<32x32xbf16>, vector<8x32xf32> -> vector<8x32xf32>
      %c0_22 = arith.constant 0 : index
      %c0_23 = arith.constant 0 : index
      %c0_24 = arith.constant 0 : index
      %26 = vector.load %arg4[%c0_22, %c0_23, %c0_24] : memref<3x1x32xf32, #tpu.memory_space<vmem>>, vector<1x1x32xf32>
      %27 = vector.shape_cast %26 : vector<1x1x32xf32> to vector<1x32xf32>
      %28 = vector.broadcast %27 : vector<1x32xf32> to vector<8x32xf32>
      %29 = arith.addf %25, %28 : vector<8x32xf32>
      %c1 = arith.constant 1 : index
      %c0_25 = arith.constant 0 : index
      %c0_26 = arith.constant 0 : index
      %30 = vector.load %arg3[%c1, %c0_25, %c0_26] : memref<3x32x32xbf16, #tpu.memory_space<vmem>>, vector<1x32x32xbf16>
      %31 = vector.shape_cast %30 : vector<1x32x32xbf16> to vector<32x32xbf16>
      %cst_27 = arith.constant dense<0.000000e+00> : vector<8x32xf32>
      %32 = tpu.matmul %22, %31, %cst_27 {dimension_numbers = #tpu.dot_dimension_numbers<[1], [0], [0], [1], [0, 0, 1, 1], [], []>} : vector<8x32xbf16>, vector<32x32xbf16>, vector<8x32xf32> -> vector<8x32xf32>
      %c1_28 = arith.constant 1 : index
      %c0_29 = arith.constant 0 : index
      %c0_30 = arith.constant 0 : index
      %33 = vector.load %arg4[%c1_28, %c0_29, %c0_30] : memref<3x1x32xf32, #tpu.memory_space<vmem>>, vector<1x1x32xf32>
      %34 = vector.shape_cast %33 : vector<1x1x32xf32> to vector<1x32xf32>
      %35 = vector.broadcast %34 : vector<1x32xf32> to vector<8x32xf32>
      %36 = arith.addf %32, %35 : vector<8x32xf32>
      %c2 = arith.constant 2 : index
      %c0_31 = arith.constant 0 : index
      %c0_32 = arith.constant 0 : index
      %37 = vector.load %arg3[%c2, %c0_31, %c0_32] : memref<3x32x32xbf16, #tpu.memory_space<vmem>>, vector<1x32x32xbf16>
      %38 = vector.shape_cast %37 : vector<1x32x32xbf16> to vector<32x32xbf16>
      %cst_33 = arith.constant dense<0.000000e+00> : vector<8x32xf32>
      %39 = tpu.matmul %22, %38, %cst_33 {dimension_numbers = #tpu.dot_dimension_numbers<[1], [0], [0], [1], [0, 0, 1, 1], [], []>} : vector<8x32xbf16>, vector<32x32xbf16>, vector<8x32xf32> -> vector<8x32xf32>
      %c2_34 = arith.constant 2 : index
      %c0_35 = arith.constant 0 : index
      %c0_36 = arith.constant 0 : index
      %40 = vector.load %arg4[%c2_34, %c0_35, %c0_36] : memref<3x1x32xf32, #tpu.memory_space<vmem>>, vector<1x1x32xf32>
      %41 = vector.shape_cast %40 : vector<1x1x32xf32> to vector<1x32xf32>
      %42 = vector.broadcast %41 : vector<1x32xf32> to vector<8x32xf32>
      %43 = arith.addf %39, %42 : vector<8x32xf32>
      %44 = vector.extract_strided_slice %29 {offsets = [0, 0], sizes = [8, 16], strides = [1, 1]} : vector<8x32xf32> to vector<8x16xf32>
      %cst_37 = arith.constant 2.500000e-01 : f32
      %45 = vector.broadcast %cst_37 : f32 to vector<8x16xf32>
      %46 = arith.mulf %44, %45 : vector<8x16xf32>
      %47 = arith.truncf %46 : vector<8x16xf32> to vector<8x16xbf16>
      %48 = vector.shape_cast %47 : vector<8x16xbf16> to vector<1x8x16xbf16>
      %49 = vector.extract_strided_slice %36 {offsets = [0, 0], sizes = [8, 16], strides = [1, 1]} : vector<8x32xf32> to vector<8x16xf32>
      %50 = arith.truncf %49 : vector<8x16xf32> to vector<8x16xbf16>
      %51 = vector.shape_cast %50 : vector<8x16xbf16> to vector<1x8x16xbf16>
      %52 = vector.extract_strided_slice %43 {offsets = [0, 0], sizes = [8, 16], strides = [1, 1]} : vector<8x32xf32> to vector<8x16xf32>
      %53 = arith.truncf %52 : vector<8x16xf32> to vector<8x16xbf16>
      %54 = vector.shape_cast %53 : vector<8x16xbf16> to vector<1x8x16xbf16>
      "tpu.trace_start"() <{level = 10 : i32, message = "bqd,bkd->bqk"}> : () -> ()
      %cst_38 = arith.constant dense<0.000000e+00> : vector<1x8x8xf32>
      %55 = tpu.matmul %48, %51, %cst_38 {dimension_numbers = #tpu.dot_dimension_numbers<[2], [2], [1], [1], [0, 0, 0, 1, 1, 1], [0], [0]>} : vector<1x8x16xbf16>, vector<1x8x16xbf16>, vector<1x8x8xf32> -> vector<1x8x8xf32>
      "tpu.trace_stop"() : () -> ()
      %cst_39 = arith.constant dense<0xFF800000> : vector<1x8xf32>
      %56 = vector.multi_reduction <maximumf>, %55, %cst_39 [2] : vector<1x8x8xf32> to vector<1x8xf32>
      %57 = vector.shape_cast %56 : vector<1x8xf32> to vector<1x8x1xf32>
      %58 = vector.broadcast %57 : vector<1x8x1xf32> to vector<1x8x8xf32>
      %59 = arith.subf %55, %58 : vector<1x8x8xf32>
      %60 = math.exp %59 : vector<1x8x8xf32>
      %cst_40 = arith.constant dense<0.000000e+00> : vector<1x8xf32>
      %61 = vector.multi_reduction <add>, %60, %cst_40 [2] : vector<1x8x8xf32> to vector<1x8xf32>
      %62 = vector.shape_cast %61 : vector<1x8xf32> to vector<1x8x1xf32>
      %63 = tpu.reciprocal %62 : vector<1x8x1xf32> -> vector<1x8x1xf32>
      %64 = vector.broadcast %63 : vector<1x8x1xf32> to vector<1x8x8xf32>
      %65 = arith.mulf %60, %64 : vector<1x8x8xf32>
      %66 = arith.truncf %65 : vector<1x8x8xf32> to vector<1x8x8xbf16>
      "tpu.trace_start"() <{level = 10 : i32, message = "bqk,bkd->bqd"}> : () -> ()
      %cst_41 = arith.constant dense<0.000000e+00> : vector<1x8x16xf32>
      %67 = tpu.matmul %66, %54, %cst_41 {dimension_numbers = #tpu.dot_dimension_numbers<[2], [1], [1], [2], [0, 0, 0, 1, 1, 2], [0], [0]>} : vector<1x8x8xbf16>, vector<1x8x16xbf16>, vector<1x8x16xf32> -> vector<1x8x16xf32>
      "tpu.trace_stop"() : () -> ()
      %68 = vector.shape_cast %67 : vector<1x8x16xf32> to vector<8x16xf32>
      %69 = vector.extract_strided_slice %29 {offsets = [0, 16], sizes = [8, 16], strides = [1, 1]} : vector<8x32xf32> to vector<8x16xf32>
      %cst_42 = arith.constant 2.500000e-01 : f32
      %70 = vector.broadcast %cst_42 : f32 to vector<8x16xf32>
      %71 = arith.mulf %69, %70 : vector<8x16xf32>
      %72 = arith.truncf %71 : vector<8x16xf32> to vector<8x16xbf16>
      %73 = vector.shape_cast %72 : vector<8x16xbf16> to vector<1x8x16xbf16>
      %74 = vector.extract_strided_slice %36 {offsets = [0, 16], sizes = [8, 16], strides = [1, 1]} : vector<8x32xf32> to vector<8x16xf32>
      %75 = arith.truncf %74 : vector<8x16xf32> to vector<8x16xbf16>
      %76 = vector.shape_cast %75 : vector<8x16xbf16> to vector<1x8x16xbf16>
      %77 = vector.extract_strided_slice %43 {offsets = [0, 16], sizes = [8, 16], strides = [1, 1]} : vector<8x32xf32> to vector<8x16xf32>
      %78 = arith.truncf %77 : vector<8x16xf32> to vector<8x16xbf16>
      %79 = vector.shape_cast %78 : vector<8x16xbf16> to vector<1x8x16xbf16>
      "tpu.trace_start"() <{level = 10 : i32, message = "bqd,bkd->bqk"}> : () -> ()
      %cst_43 = arith.constant dense<0.000000e+00> : vector<1x8x8xf32>
      %80 = tpu.matmul %73, %76, %cst_43 {dimension_numbers = #tpu.dot_dimension_numbers<[2], [2], [1], [1], [0, 0, 0, 1, 1, 1], [0], [0]>} : vector<1x8x16xbf16>, vector<1x8x16xbf16>, vector<1x8x8xf32> -> vector<1x8x8xf32>
      "tpu.trace_stop"() : () -> ()
      %cst_44 = arith.constant dense<0xFF800000> : vector<1x8xf32>
      %81 = vector.multi_reduction <maximumf>, %80, %cst_44 [2] : vector<1x8x8xf32> to vector<1x8xf32>
      %82 = vector.shape_cast %81 : vector<1x8xf32> to vector<1x8x1xf32>
      %83 = vector.broadcast %82 : vector<1x8x1xf32> to vector<1x8x8xf32>
      %84 = arith.subf %80, %83 : vector<1x8x8xf32>
      %85 = math.exp %84 : vector<1x8x8xf32>
      %cst_45 = arith.constant dense<0.000000e+00> : vector<1x8xf32>
      %86 = vector.multi_reduction <add>, %85, %cst_45 [2] : vector<1x8x8xf32> to vector<1x8xf32>
      %87 = vector.shape_cast %86 : vector<1x8xf32> to vector<1x8x1xf32>
      %88 = tpu.reciprocal %87 : vector<1x8x1xf32> -> vector<1x8x1xf32>
      %89 = vector.broadcast %88 : vector<1x8x1xf32> to vector<1x8x8xf32>
      %90 = arith.mulf %85, %89 : vector<1x8x8xf32>
      %91 = arith.truncf %90 : vector<1x8x8xf32> to vector<1x8x8xbf16>
      "tpu.trace_start"() <{level = 10 : i32, message = "bqk,bkd->bqd"}> : () -> ()
      %cst_46 = arith.constant dense<0.000000e+00> : vector<1x8x16xf32>
      %92 = tpu.matmul %91, %79, %cst_46 {dimension_numbers = #tpu.dot_dimension_numbers<[2], [1], [1], [2], [0, 0, 0, 1, 1, 2], [0], [0]>} : vector<1x8x8xbf16>, vector<1x8x16xbf16>, vector<1x8x16xf32> -> vector<1x8x16xf32>
      "tpu.trace_stop"() : () -> ()
      %93 = vector.shape_cast %92 : vector<1x8x16xf32> to vector<8x16xf32>
      %94 = tpu.concatenate %68, %93 in 1 : vector<8x16xf32>, vector<8x16xf32> -> vector<8x32xf32>
      %95 = arith.truncf %94 : vector<8x32xf32> to vector<8x32xbf16>
      %c0_47 = arith.constant 0 : index
      %c0_48 = arith.constant 0 : index
      %96 = vector.load %arg5[%c0_47, %c0_48] : memref<32x32xbf16, #tpu.memory_space<vmem>>, vector<32x32xbf16>
      %cst_49 = arith.constant dense<0.000000e+00> : vector<8x32xf32>
      %97 = tpu.matmul %95, %96, %cst_49 {dimension_numbers = #tpu.dot_dimension_numbers<[1], [0], [0], [1], [0, 0, 1, 1], [], []>} : vector<8x32xbf16>, vector<32x32xbf16>, vector<8x32xf32> -> vector<8x32xf32>
      %c0_50 = arith.constant 0 : index
      %c0_51 = arith.constant 0 : index
      %98 = vector.load %arg6[%c0_50, %c0_51] : memref<1x32xf32, #tpu.memory_space<vmem>>, vector<1x32xf32>
      %99 = vector.broadcast %98 : vector<1x32xf32> to vector<8x32xf32>
      %100 = arith.addf %97, %99 : vector<8x32xf32>
      %101 = arith.addf %21, %100 : vector<8x32xf32>
      %cst_52 = arith.constant dense<0.000000e+00> : vector<8xf32>
      %102 = vector.multi_reduction <add>, %101, %cst_52 [1] : vector<8x32xf32> to vector<8xf32>
      %103 = vector.shape_cast %102 : vector<8xf32> to vector<8x1xf32>
      %cst_53 = arith.constant 3.200000e+01 : f32
      %104 = vector.broadcast %cst_53 : f32 to vector<8x1xf32>
      %105 = arith.divf %103, %104 : vector<8x1xf32>
      %106 = vector.broadcast %105 : vector<8x1xf32> to vector<8x32xf32>
      %107 = arith.subf %101, %106 : vector<8x32xf32>
      %108 = arith.mulf %107, %107 : vector<8x32xf32>
      %cst_54 = arith.constant dense<0.000000e+00> : vector<8xf32>
      %109 = vector.multi_reduction <add>, %108, %cst_54 [1] : vector<8x32xf32> to vector<8xf32>
      %110 = vector.shape_cast %109 : vector<8xf32> to vector<8x1xf32>
      %cst_55 = arith.constant 3.200000e+01 : f32
      %111 = vector.broadcast %cst_55 : f32 to vector<8x1xf32>
      %112 = arith.divf %110, %111 : vector<8x1xf32>
      %113 = vector.broadcast %105 : vector<8x1xf32> to vector<8x32xf32>
      %114 = arith.subf %101, %113 : vector<8x32xf32>
      %cst_56 = arith.constant 9.99999974E-6 : f32
      %115 = vector.broadcast %cst_56 : f32 to vector<8x1xf32>
      %116 = arith.addf %112, %115 : vector<8x1xf32>
      %117 = math.rsqrt %116 : vector<8x1xf32>
      %118 = vector.broadcast %117 : vector<8x1xf32> to vector<8x32xf32>
      %119 = arith.mulf %114, %118 : vector<8x32xf32>
      %c0_57 = arith.constant 0 : index
      %c0_58 = arith.constant 0 : index
      %120 = vector.load %arg7[%c0_57, %c0_58] : memref<1x32xf32, #tpu.memory_space<vmem>>, vector<1x32xf32>
      %121 = vector.broadcast %120 : vector<1x32xf32> to vector<8x32xf32>
      %122 = arith.mulf %119, %121 : vector<8x32xf32>
      %c0_59 = arith.constant 0 : index
      %c0_60 = arith.constant 0 : index
      %123 = vector.load %arg8[%c0_59, %c0_60] : memref<1x32xf32, #tpu.memory_space<vmem>>, vector<1x32xf32>
      %124 = vector.broadcast %123 : vector<1x32xf32> to vector<8x32xf32>
      %125 = arith.addf %122, %124 : vector<8x32xf32>
      %c0_61 = arith.constant 0 : index
      %c0_62 = arith.constant 0 : index
      %126 = vector.load %arg16[%c0_61, %c0_62] : memref<8x32xf32, #tpu.memory_space<vmem>>, vector<8x32xf32>
      tpu.vector_store %arg16[%c0_61, %c0_62], %125 {strides = array<i32>} : memref<8x32xf32, #tpu.memory_space<vmem>>, vector<8x32xf32>,
      %127 = arith.truncf %125 : vector<8x32xf32> to vector<8x32xbf16>
      %c0_63 = arith.constant 0 : index
      %c0_64 = arith.constant 0 : index
      %128 = vector.load %arg17[%c0_63, %c0_64] : memref<8x32xbf16, #tpu.memory_space<vmem>>, vector<8x32xbf16>
      tpu.vector_store %arg17[%c0_63, %c0_64], %127 {strides = array<i32>} : memref<8x32xbf16, #tpu.memory_space<vmem>>, vector<8x32xbf16>,
      %cst_65 = arith.constant 0.000000e+00 : f32
      %129 = vector.broadcast %cst_65 : f32 to vector<8x32xf32>
      %c0_66 = arith.constant 0 : index
      %c0_67 = arith.constant 0 : index
      %130 = vector.load %arg18[%c0_66, %c0_67] : memref<8x32xf32, #tpu.memory_space<vmem>>, vector<8x32xf32>
      tpu.vector_store %arg18[%c0_66, %c0_67], %129 {strides = array<i32>} : memref<8x32xf32, #tpu.memory_space<vmem>>, vector<8x32xf32>,
    } else {
    }
    %c0 = arith.constant 0 : index
    %c0_1 = arith.constant 0 : index
    %3 = vector.load %arg17[%c0, %c0_1] : memref<8x32xbf16, #tpu.memory_space<vmem>>, vector<8x32xbf16>
    %c0_2 = arith.constant 0 : index
    %c0_3 = arith.constant 0 : index
    %4 = vector.load %arg9[%c0_2, %c0_3] : memref<32x512xbf16, #tpu.memory_space<vmem>>, vector<32x512xbf16>
    %cst = arith.constant dense<0.000000e+00> : vector<8x512xf32>
    %5 = tpu.matmul %3, %4, %cst {dimension_numbers = #tpu.dot_dimension_numbers<[1], [0], [0], [1], [0, 0, 1, 1], [], []>} : vector<8x32xbf16>, vector<32x512xbf16>, vector<8x512xf32> -> vector<8x512xf32>
    %c0_4 = arith.constant 0 : index
    %c0_5 = arith.constant 0 : index
    %6 = vector.load %arg10[%c0_4, %c0_5] : memref<1x512xf32, #tpu.memory_space<vmem>>, vector<1x512xf32>
    %7 = vector.broadcast %6 : vector<1x512xf32> to vector<8x512xf32>
    %8 = arith.addf %5, %7 : vector<8x512xf32>
    %cst_6 = arith.constant 0.000000e+00 : f32
    %9 = vector.broadcast %cst_6 : f32 to vector<8x512xf32>
    %10 = arith.maximumf %8, %9 : vector<8x512xf32>
    %c0_7 = arith.constant 0 : index
    %c0_8 = arith.constant 0 : index
    %11 = vector.load %arg18[%c0_7, %c0_8] : memref<8x32xf32, #tpu.memory_space<vmem>>, vector<8x32xf32>
    %12 = arith.truncf %10 : vector<8x512xf32> to vector<8x512xbf16>
    %c0_9 = arith.constant 0 : index
    %c0_10 = arith.constant 0 : index
    %13 = vector.load %arg11[%c0_9, %c0_10] : memref<512x32xbf16, #tpu.memory_space<vmem>>, vector<512x32xbf16>
    %cst_11 = arith.constant dense<0.000000e+00> : vector<8x32xf32>
    %14 = tpu.matmul %12, %13, %cst_11 {dimension_numbers = #tpu.dot_dimension_numbers<[1], [0], [0], [1], [0, 0, 1, 1], [], []>} : vector<8x512xbf16>, vector<512x32xbf16>, vector<8x32xf32> -> vector<8x32xf32>
    %15 = arith.addf %11, %14 : vector<8x32xf32>
    %c0_12 = arith.constant 0 : index
    %c0_13 = arith.constant 0 : index
    %16 = vector.load %arg18[%c0_12, %c0_13] : memref<8x32xf32, #tpu.memory_space<vmem>>, vector<8x32xf32>
    tpu.vector_store %arg18[%c0_12, %c0_13], %15 {strides = array<i32>} : memref<8x32xf32, #tpu.memory_space<vmem>>, vector<8x32xf32>,
    %c3_i32 = arith.constant 3 : i32
    %17 = arith.cmpi eq, %arg1, %c3_i32 : i32
    %18 = arith.extui %17 : i1 to i32
    %c0_i32_14 = arith.constant 0 : i32
    %19 = arith.cmpi ne, %18, %c0_i32_14 : i32
    scf.if %19 {
      %c0_15 = arith.constant 0 : index
      %c0_16 = arith.constant 0 : index
      %20 = vector.load %arg16[%c0_15, %c0_16] : memref<8x32xf32, #tpu.memory_space<vmem>>, vector<8x32xf32>
      %c0_17 = arith.constant 0 : index
      %c0_18 = arith.constant 0 : index
      %21 = vector.load %arg18[%c0_17, %c0_18] : memref<8x32xf32, #tpu.memory_space<vmem>>, vector<8x32xf32>
      %22 = arith.addf %20, %21 : vector<8x32xf32>
      %c0_19 = arith.constant 0 : index
      %c0_20 = arith.constant 0 : index
      %23 = vector.load %arg12[%c0_19, %c0_20] : memref<1x32xf32, #tpu.memory_space<vmem>>, vector<1x32xf32>
      %24 = vector.broadcast %23 : vector<1x32xf32> to vector<8x32xf32>
      %25 = arith.addf %22, %24 : vector<8x32xf32>
      %cst_21 = arith.constant dense<0.000000e+00> : vector<8xf32>
      %26 = vector.multi_reduction <add>, %25, %cst_21 [1] : vector<8x32xf32> to vector<8xf32>
      %27 = vector.shape_cast %26 : vector<8xf32> to vector<8x1xf32>
      %cst_22 = arith.constant 3.200000e+01 : f32
      %28 = vector.broadcast %cst_22 : f32 to vector<8x1xf32>
      %29 = arith.divf %27, %28 : vector<8x1xf32>
      %30 = vector.broadcast %29 : vector<8x1xf32> to vector<8x32xf32>
      %31 = arith.subf %25, %30 : vector<8x32xf32>
      %32 = arith.mulf %31, %31 : vector<8x32xf32>
      %cst_23 = arith.constant dense<0.000000e+00> : vector<8xf32>
      %33 = vector.multi_reduction <add>, %32, %cst_23 [1] : vector<8x32xf32> to vector<8xf32>
      %34 = vector.shape_cast %33 : vector<8xf32> to vector<8x1xf32>
      %cst_24 = arith.constant 3.200000e+01 : f32
      %35 = vector.broadcast %cst_24 : f32 to vector<8x1xf32>
      %36 = arith.divf %34, %35 : vector<8x1xf32>
      %37 = vector.broadcast %29 : vector<8x1xf32> to vector<8x32xf32>
      %38 = arith.subf %25, %37 : vector<8x32xf32>
      %cst_25 = arith.constant 9.99999974E-6 : f32
      %39 = vector.broadcast %cst_25 : f32 to vector<8x1xf32>
      %40 = arith.addf %36, %39 : vector<8x1xf32>
      %41 = math.rsqrt %40 : vector<8x1xf32>
      %42 = vector.broadcast %41 : vector<8x1xf32> to vector<8x32xf32>
      %43 = arith.mulf %38, %42 : vector<8x32xf32>
      %c0_26 = arith.constant 0 : index
      %c0_27 = arith.constant 0 : index
      %44 = vector.load %arg13[%c0_26, %c0_27] : memref<1x32xf32, #tpu.memory_space<vmem>>, vector<1x32xf32>
      %45 = vector.broadcast %44 : vector<1x32xf32> to vector<8x32xf32>
      %46 = arith.mulf %43, %45 : vector<8x32xf32>
      %c0_28 = arith.constant 0 : index
      %c0_29 = arith.constant 0 : index
      %47 = vector.load %arg14[%c0_28, %c0_29] : memref<1x32xf32, #tpu.memory_space<vmem>>, vector<1x32xf32>
      %48 = vector.broadcast %47 : vector<1x32xf32> to vector<8x32xf32>
      %49 = arith.addf %46, %48 : vector<8x32xf32>
      %50 = vector.shape_cast %49 : vector<8x32xf32> to vector<1x8x32xf32>
      %c0_30 = arith.constant 0 : index
      %c0_31 = arith.constant 0 : index
      %c0_32 = arith.constant 0 : index
      %51 = vector.load %arg15[%c0_30, %c0_31, %c0_32] : memref<1x8x32xf32, #tpu.memory_space<vmem>>, vector<1x8x32xf32>
      tpu.vector_store %arg15[%c0_30, %c0_31, %c0_32], %50 {strides = array<i32>} : memref<1x8x32xf32, #tpu.memory_space<vmem>>, vector<1x8x32xf32>,
    } else {
    }
    return
  }
  func.func @transform_0(%arg0: i32, %arg1: i32) -> (i32, i32, i32) {
    %c0_i32 = arith.constant 0 : i32
    %c0_i32_0 = arith.constant 0 : i32
    %c0_i32_1 = arith.constant 0 : i32
    return %arg0, %c0_i32, %c0_i32_0 : i32, i32, i32
  }
  func.func @transform_1(%arg0: i32, %arg1: i32) -> (i32, i32, i32) {
    %c0_i32 = arith.constant 0 : i32
    %c0_i32_0 = arith.constant 0 : i32
    %c0_i32_1 = arith.constant 0 : i32
    %c0_i32_2 = arith.constant 0 : i32
    return %c0_i32, %c0_i32_0, %c0_i32_1 : i32, i32, i32
  }
  func.func @transform_2(%arg0: i32, %arg1: i32) -> (i32, i32, i32) {
    %c0_i32 = arith.constant 0 : i32
    %c0_i32_0 = arith.constant 0 : i32
    %c0_i32_1 = arith.constant 0 : i32
    %c0_i32_2 = arith.constant 0 : i32
    return %c0_i32, %c0_i32_0, %c0_i32_1 : i32, i32, i32
  }
  func.func @transform_3(%arg0: i32, %arg1: i32) -> (i32, i32) {
    %c0_i32 = arith.constant 0 : i32
    %c0_i32_0 = arith.constant 0 : i32
    %c0_i32_1 = arith.constant 0 : i32
    return %c0_i32, %c0_i32_0 : i32, i32
  }
  func.func @transform_4(%arg0: i32, %arg1: i32) -> (i32, i32) {
    %c0_i32 = arith.constant 0 : i32
    %c0_i32_0 = arith.constant 0 : i32
    %c0_i32_1 = arith.constant 0 : i32
    return %c0_i32, %c0_i32_0 : i32, i32
  }
  func.func @transform_5(%arg0: i32, %arg1: i32) -> (i32, i32) {
    %c0_i32 = arith.constant 0 : i32
    %c0_i32_0 = arith.constant 0 : i32
    %c0_i32_1 = arith.constant 0 : i32
    return %c0_i32, %c0_i32_0 : i32, i32
  }
  func.func @transform_6(%arg0: i32, %arg1: i32) -> (i32, i32) {
    %c0_i32 = arith.constant 0 : i32
    %c0_i32_0 = arith.constant 0 : i32
    %c0_i32_1 = arith.constant 0 : i32
    return %c0_i32, %c0_i32_0 : i32, i32
  }
  func.func @transform_7(%arg0: i32, %arg1: i32) -> (i32, i32) {
    %c0_i32 = arith.constant 0 : i32
    %c0_i32_0 = arith.constant 0 : i32
    return %c0_i32, %arg1 : i32, i32
  }
  func.func @transform_8(%arg0: i32, %arg1: i32) -> (i32, i32) {
    %c0_i32 = arith.constant 0 : i32
    %c0_i32_0 = arith.constant 0 : i32
    return %c0_i32, %arg1 : i32, i32
  }
  func.func @transform_9(%arg0: i32, %arg1: i32) -> (i32, i32) {
    %c0_i32 = arith.constant 0 : i32
    %c0_i32_0 = arith.constant 0 : i32
    return %arg1, %c0_i32 : i32, i32
  }
  func.func @transform_10(%arg0: i32, %arg1: i32) -> (i32, i32) {
    %c0_i32 = arith.constant 0 : i32
    %c0_i32_0 = arith.constant 0 : i32
    %c0_i32_1 = arith.constant 0 : i32
    return %c0_i32, %c0_i32_0 : i32, i32
  }
  func.func @transform_11(%arg0: i32, %arg1: i32) -> (i32, i32) {
    %c0_i32 = arith.constant 0 : i32
    %c0_i32_0 = arith.constant 0 : i32
    %c0_i32_1 = arith.constant 0 : i32
    return %c0_i32, %c0_i32_0 : i32, i32
  }
  func.func @transform_12(%arg0: i32, %arg1: i32) -> (i32, i32) {
    %c0_i32 = arith.constant 0 : i32
    %c0_i32_0 = arith.constant 0 : i32
    %c0_i32_1 = arith.constant 0 : i32
    return %c0_i32, %c0_i32_0 : i32, i32
  }
  func.func @transform_13(%arg0: i32, %arg1: i32) -> (i32, i32, i32) {
    %c0_i32 = arith.constant 0 : i32
    %c0_i32_0 = arith.constant 0 : i32
    %c0_i32_1 = arith.constant 0 : i32
    return %arg0, %c0_i32, %c0_i32_0 : i32, i32, i32
  }
}

</mosaic_0001>

<bundles_post_ra>
// kernel: tpu_custom_call.1
= control target key start
LH: loop header
LB: loop body
LE: loop exit
PB: predicated region body
PF: predicated region fallthrough
CT: control target
= control target key end

     0   :  { %s2667_s0 = inlined_call_operand.vmem [shape: f32[2,8,32], index: 0, kind: input, shape index: {}]   ;;  %s2668_s1 = inlined_call_operand.vmem [shape: bf16[3,32,32], index: 1, kind: input, shape index: {}]   ;;  %s2669_s2 = inlined_call_operand.vmem [shape: f32[3,1,32], index: 2, kind: input, shape index: {}]   ;;  %s2670_s3 = inlined_call_operand.vmem [shape: bf16[32,32], index: 3, kind: input, shape index: {}]   ;;  %s2671_s4 = inlined_call_operand.vmem [shape: f32[1,32], index: 4, kind: input, shape index: {}]   ;;  %s2672_s5 = inlined_call_operand.vmem [shape: f32[1,32], index: 5, kind: input, shape index: {}]   ;;  %s2673_s6 = inlined_call_operand.vmem [shape: f32[1,32], index: 6, kind: input, shape index: {}]   ;;  %s2674_s7 = inlined_call_operand.vmem [shape: bf16[32,2048], index: 7, kind: input, shape index: {}]   ;;  %s2675_s8 = inlined_call_operand.vmem [shape: f32[1,2048], index: 8, kind: input, shape index: {}]   ;;  %s2676_s9 = inlined_call_operand.vmem [shape: bf16[2048,32], index: 9, kind: input, shape index: {}]   ;;  %s2677_s10 = inlined_call_operand.vmem [shape: f32[1,32], index: 10, kind: input, shape index: {}]   ;;  %s2678_s11 = inlined_call_operand.vmem [shape: f32[1,32], index: 11, kind: input, shape index: {}]   ;;  %s2679_s12 = inlined_call_operand.vmem [shape: f32[1,32], index: 12, kind: input, shape index: {}]   ;;  %s2680_s13 = inlined_call_operand.hbm [shape: f32[2,8,32], index: 13, kind: output, shape index: {}]  }
   0x1   :  { %2693 = sst [smem:[#allocation20_spill]] %s2674_s7 }
   0x2   :  { %2694 = sst [smem:[#allocation21_spill]] %s2677_s10 }
   0x3   :  { %2695 = sst [smem:[#allocation22_spill]] %s2678_s11 }
   0x4   :  { %2696 = sst [smem:[#allocation23_spill]] %s2679_s12 }
   0x5   :  { %2697 = sst [smem:[#allocation24_spill]] %s2680_s13 }
   0x6   :  { %18 = vsyncpa [#allocation7], 0 }
   0x7   :  { %20 = vsyncpa [#allocation7 + $0x1], 0  ;;  %s2315_s25 = smov 0   ;;  %s2317_s26 = smov 0  }
   0x8   :  { %s2319_s27 = smov 0   ;;  %s2321_s28 = smov 0  }
   0x9   :  { %s2323_s29 = smov 0   ;;  %s2325_s30 = smov 0  }
   0xa   :  { %s2327_s14 = smov 0   ;;  %s2329_s15 = smov 0  }
   0xb   :  { %s2331_s16 = smov 0   ;;  %s2333_s17 = smov 0  }
   0xc LB: > { %2698 = sst [smem:[#allocation9_spill]] %s2201_s25  ;;  %s1753_s18 = sadd.s32 4294967295, %s2237_s17   ;;  %s2237_s17 = sphi %s2333_s17, %s26_s17   ;;  %s2233_s16 = sphi %s2331_s16, %s2729_s16   ;;  %s2229_s15 = sphi %s2329_s15, %s2728_s15   ;;  %s2225_s14 = sphi %s2327_s14, %s2727_s14   ;;  %s2221_s30 = sphi %s2325_s30, %s2726_s30   ;;  %s2217_s29 = sphi %s2323_s29, %s2725_s29   ;;  %s2213_s28 = sphi %s2321_s28, %s2724_s28   ;;  %s2209_s27 = sphi %s2319_s27, %s2723_s27   ;;  %s2205_s26 = sphi %s2317_s26, %s2731_s26   ;;  %s2201_s25 = sphi %s2315_s25, %s2730_s25  }
   0xd   : > { %2699 = sst [smem:[#allocation10_spill]] %s2209_s27  ;;  %s1754_s19 = sadd.s32 4294967294, %s2237_s17  }
   0xe   : > { %2700 = sst [smem:[#allocation11_spill]] %s2217_s29  ;;  %s35_s20 = sadd.s32 1, %s2229_s15 }
   0xf   : > { %2701 = sst [smem:[#allocation12_spill]] %s2229_s15  ;;  %s38_s21 = sadd.s32 1, %s2233_s16 }
  0x10   : > { %2702 = sst [smem:[#allocation13_spill]] %s2233_s16  ;;  %p36_p0 = scmp.ge.s32.totalorder %s35_s20, 4 }
  0x11   : > { %2703 = sst [smem:[#allocation14_spill]] %s2237_s17  ;;  %s197_s22 = sadd.s32 1, %s2217_s29 }
  0x12   : > { %p204_p1 = scmp.ne.s32.totalorder %s2217_s29, %s2213_s28  ;;  %p205_p2 = scmp.eq.s32.totalorder %s2237_s17, 0 }
  0x13   : > { %s2733_s20 = smov (%p36_p0, %s35_s20), 0  ;;  %s2735_s21 = smov (!%p36_p0, %s38_s21), %s2233_s16 }
  0x14   : > { %2704 = sst [smem:[#allocation15_spill]] %s2733_s20  ;;  %s194_s23 = ssub.s32 %s2229_s15, %s2733_s20 }
  0x15   : > { %p2378_p3 = por %p205_p2, %p204_p1  ;;  %p40_p4 = scmp.ge.s32.totalorder %s2735_s21, 2 }
  0x16   : > { %p195_p5 = scmp.eq.s32.totalorder %s194_s23, 0  ;;  %s338_s13 = sadd.s32 1, %s2209_s27 }
  0x17   : > { %p348_p6 = scmp.ne.s32.totalorder %s2209_s27, %s2205_s26  ;;  %s2737_s21 = smov (%p40_p4, %s2735_s21), 0 }
  0x18   : > { %2706 = sst [smem:[#allocation16_spill]] %s2737_s21  ;;  %s335_s11 = ssub.s32 %s2233_s16, %s2737_s21 }
  0x19   : > { %s2388_s12 = scalar_select %p195_p5, %s2217_s29, %s197_s22  }
  0x1a   : > { %p349_p7 = scmp.eq.s32.totalorder %s1753_s18, 7  ;;  %p336_p8 = scmp.eq.s32.totalorder %s335_s11, 0 }
  0x1b   : > { %2707 = sst [smem:[#allocation17_spill]] %s2388_s12  ;;  %p354_p9 = scmp.ne.s32.totalorder %s2205_s26, %s2201_s25 }
  0x1c   : > { %p2394_p10 = por %p349_p7, %p348_p6  ;;  %p355_p11 = scmp.eq.s32.totalorder %s1754_s19, 7 }
  0x1d   : > { %s2399_s20 = scalar_select %p336_p8, %s2209_s27, %s338_s13  }
  0x1e   : > { %p2401_p12 = por %p355_p11, %p354_p9  ;;  %p1756_p13 = scmp.ge.s32.totalorder %s2237_s17, 8 }
  0x1f   : > { %2709 = sst [smem:[#allocation18_spill]] %s2399_s20 }
  0x20   : > { %s2710_s23 = scalar_select %p2401_p12, 1, 0 }
  0x21   : > { %398 = sbr.rel (%p1756_p13) target bundleno = 54 (0x36), region = 52 }
  0x22   : > { %2711 = sst [smem:[#allocation19_spill]] %s2710_s23 }
  0x28   : > { %408 = sbr.rel (!%p2378_p3) target bundleno = 54 (0x36), region = 60  ;;  %s410_s11 = sand.u32 (%p2378_p3), 1, %s2217_s29  }
  0x29   : > { %s1850_s18 = sshll.u32 (%p2378_p3), %s2229_s15, 4  ;;  %s1757_s22 = sshll.u32 (%p2378_p3), %s410_s11, 6 }
  0x2a   : > { %s2712_s7 = sld [smem:[#allocation20_spill]] (%p2378_p3)  ;;  %s412_s19 = scalar_lea.vmem (%p2378_p3), [#allocation5], %s1757_s22 }
  0x30   : > { %s415_s13 = scalar_lea.vmem %s2712_s7, %s1850_s18 }
  0x31   : > { %v428_v0 = vld [vmem:[%s415_s13] sm:$0xff]  ;;  %v430_v1 = vld [vmem:[%s415_s13 + $0x8] sm:$0xff] }
  0x32   : > { %v432_v2 = vld [vmem:[%s415_s13 + $0x40] sm:$0xff]  ;;  %429 = vst [vmem:[%s412_s19] sm:$0xff] %v428_v0  ;;  %431 = vst [vmem:[%s412_s19 + $0x8] sm:$0xff] %v430_v1  ;;  %v434_v3 = vld [vmem:[%s415_s13 + $0x48] sm:$0xff] }
  0x33   : > { %433 = vst [vmem:[%s412_s19 + $0x10] sm:$0xff] %v432_v2  ;;  %v436_v4 = vld [vmem:[%s415_s13 + $0x80] sm:$0xff]  ;;  %v438_v5 = vld [vmem:[%s415_s13 + $0x88] sm:$0xff]  ;;  %435 = vst [vmem:[%s412_s19 + $0x18] sm:$0xff] %v434_v3 }
  0x34   : > { %437 = vst [vmem:[%s412_s19 + $0x20] sm:$0xff] %v436_v4  ;;  %439 = vst [vmem:[%s412_s19 + $0x28] sm:$0xff] %v438_v5  ;;  %v440_v6 = vld [vmem:[%s415_s13 + $0xc0] sm:$0xff]  ;;  %v442_v7 = vld [vmem:[%s415_s13 + $0xc8] sm:$0xff] }
  0x35   : > { %441 = vst [vmem:[%s412_s19 + $0x30] sm:$0xff] %v440_v6  ;;  %443 = vst [vmem:[%s412_s19 + $0x38] sm:$0xff] %v442_v7 }
  0x36 PF: > { %p1760_p0 = scmp.ge.s32.totalorder %s2237_s17, 1  ;;  %p465_p1 = scmp.lt.s32.totalorder %s2237_s17, 9 }
  0x38   : > { %p466_p2 = pnand %p1760_p0, %p465_p1 }
  0x39   : > { %s472_s16 = sand.u32 (!%p466_p2), 1, %s2213_s28   ;;  %s2686_s21 = sand.u32 (!%p466_p2), 1, %s2205_s26  }
  0x3a   : > { %469 = sbr.rel (%p466_p2) target bundleno = 2607 (0xa2f), region = 91  ;;  %s1761_s24 = sshll.u32 (!%p466_p2), %s472_s16, 6 }
  0x3b   : > { %s2419_s11 = sshll.u32 (!%p466_p2), %s2686_s21, 3  ;;  %p528_p3 = scmp.lt.s32.totalorder (!%p466_p2), %s2225_s14, 1 }
  0x3c   : > { %s1764_s18 = sshll.u32 (!%p466_p2), %s2221_s30, 2  ;;  %s1765_s22 = sshll.u32 (!%p466_p2), %s2221_s30, 6 }
  0x3d   : > { %p534_p4 = scmp.lt.s32.totalorder (!%p466_p2), %s1764_s18, 15  ;;  %p539_p5 = scmp.lt.s32.totalorder (!%p466_p2), %s1765_s22, 255 }
  0x3e   : > { %s2439_s25 = scalar_lea.vmem (!%p466_p2), [#allocation5], %s1761_s24  ;;  %s527_s17 = scalar_lea.vmem (!%p466_p2), [#allocation6], %s2419_s11 }
  0x3f   : > { %p1767_p6 = scmp.ne.s32.totalorder (!%p466_p2), %s2221_s30, 0 }
  0x41   : > { %s529_s13 = scalar_select %p528_p3, %s2225_s14, 1 }
  0x42   : > { %s2739_s18 = smov (!%p534_p4, %s1764_s18), 15  ;;  %s2741_s22 = smov (!%p539_p5, %s1765_s22), 255 }
  0x43   : > { %s1763_s19 = sshll.u32 %s529_s13, 3  ;;  %s536_s21 = scalar_lea.vmem %s2675_s8, %s2739_s18  ;;  %v2063_v8 = vld [vmem:[%s2668_s1 + $0x10] sm:$0xff] (!%p1767_p6)   ;;  %v2239_v9 = vmov (!%p1767_p6), 0.0   ;;  %v2064_v10 = vld [vmem:[%s2668_s1] sm:$0xff] (!%p1767_p6)   ;;  %v2065_v11 = vld [vmem:[%s2668_s1 + $0x18] sm:$0xff] (!%p1767_p6)   ;;  %vm2240_vm0 = vmmov (!%p1767_p6), 0  }
  0x44   : > { %s531_s28 = scalar_lea.vmem %s2667_s0, %s1763_s19  ;;  %s1766_s29 = sshll.u32 %s2741_s22, 2  ;;  %1923 = vmatprep.subr.bf16.mxu1 (!%p1767_p6), %v2239_v9  ;;  %1915 = vmatprep.subr.bf16.mxu0 (!%p1767_p6), %v2239_v9  ;;  %vm574_vm1 = vcmask (!%p1767_p6), 261120   ;;  %v2066_v13 = vld [vmem:[%s2668_s1 + $0x8] sm:$0xff] (!%p1767_p6)   ;;  %v1777_v15 = vld [vmem:[%s2669_s2 + $0x1] ss:$0 sm:$0xff] (!%p1767_p6)  ;;  %vm752_vm2 = vcmask (!%p1767_p6), 130048  }
  0x45   : > { %s2437_s23 = scalar_lea.vmem %s2676_s9, %s1766_s29  ;;  %548 = sbr.rel (%p1767_p6) target bundleno = 1805 (0x70d), region = 99  ;;  %1924 = vmatpush3.bf16.msra.mxu1 (!%p1767_p6), %v2063_v8  ;;  %1927 = vmatprep.mubr.msk.bf16.mxu1 (!%p1767_p6), %vm2240_vm0, %v2239_v9  ;;  %v2457_v12 = vld [vmem:[%s531_s28] sm:$0xff] (!%p1767_p6)  ;;  %1079 = vst.msk [vmem:[#allocation4] sm:$0xff] (!%p1767_p6), %vm574_vm1, %v2239_v9  ;;  %v2068_v32 = vld [vmem:[%s2668_s1 + $0x28] sm:$0xff] (!%p1767_p6)   ;;  %vm799_vm3 = vcmask (!%p1767_p6), 64512   ;;  %vm815_vm4 = vcmask (!%p1767_p6), 1043456  }
  0x46   : > { %1925 = vmatprep.subr.bf16.mxu1 (!%p1767_p6), %v2239_v9  ;;  %1916 = vmatpush3.bf16.msra.mxu0 (!%p1767_p6), %v2064_v10  ;;  %v550_v14 = vpack.c.bf16 (!%p1767_p6), %v2457_v12, %v2457_v12  ;;  %v1768_v16 = vld [vmem:[%s2669_s2] ss:$0 sm:$0xff] (!%p1767_p6)  ;;  %s2241_s13 = smov (!%p1767_p6), 112   ;;  %v1786_v54 = vld [vmem:[%s2669_s2 + $0x2] ss:$0 sm:$0xff] (!%p1767_p6)  ;;  %s2242_s16 = smov (!%p1767_p6), 16  }
  0x47   : > { %1917 = vmatprep.subr.bf16.mxu0 (!%p1767_p6), %v2239_v9  ;;  %1919 = vmatprep.mubr.msk.bf16.mxu0 (!%p1767_p6), %vm2240_vm0, %v2239_v9  ;;  %v2067_v31 = vld [vmem:[%s2668_s1 + $0x20] sm:$0xff] (!%p1767_p6)   ;;  %vm1077_vm5 = vcmask (!%p1767_p6), 257024  }
  0x49   : > { %1926 = vmatpush3.bf16.msra.mxu1 (!%p1767_p6), %v2065_v11  ;;  %v2069_v11 = vld [vmem:[%s2670_s3] sm:$0xff] (!%p1767_p6)  }
  0x4a   : > { %1918 = vmatpush3.bf16.msra.mxu0 (!%p1767_p6), %v2066_v13  ;;  %1939 = vmatprep.subr.bf16.mxu1 (!%p1767_p6), %v2239_v9 }
  0x4b   : > { %1931 = vmatprep.subr.bf16.mxu0 (!%p1767_p6), %v2239_v9 }
  0x4c   : > { %1928 = vmatmul.mubr.msk.bf16.vlgmr.msra.gmra.mrb[0].mxu1 %vm574_vm1, %v550_v14 }
  0x4d   : > { %1920 = vmatmul.mubr.msk.bf16.vlgmr.msra.gmra.mrb[0].mxu0 %vm574_vm1, %v550_v14  ;;  %1941 = vmatprep.mubr.msk.bf16.mxu1 %vm2240_vm0, %v2239_v9 }
  0x4e   : > { %1935 = vmatprep.mubr.msk.bf16.mxu0 %vm2240_vm0, %v2239_v9  ;;  %1932 = vmatpush3.bf16.msra.mxu0 %v2067_v31 }
  0x4f   : > { %1933 = vmatprep.subr.bf16.mxu0 %v2239_v9 }
  0x52   : > { %1934 = vmatpush3.bf16.msra.mxu0 %v2068_v32 }
  0x53   : > { %1945 = vmatprep.subr.bf16.mxu0 %v2239_v9 }
  0x55   : > { %1936 = vmatmul.mubr.msk.bf16.vlgmr.msra.gmra.mrb[4].mxu0 %vm574_vm1, %v550_v14 }
  0x56   : > { %1947 = vmatprep.mubr.msk.bf16.mxu0 %vm2240_vm0, %v2239_v9 }
 0x11f   : > { %v677_v17 = vpop.f32.mrb[0].mxu1 }
 0x120   : > { %v678_v18 = vadd.f32 %v1777_v15, %v677_v17  ;;  %v1929_v19 = vpop.f32.mrb[1].mxu1  ;;  %v612_v20 = vpop.f32.mrb[0].mxu0  ;;  %v2070_v17 = vld [vmem:[%s2670_s3 + $0x8] sm:$0xff]  }
 0x121   : > { %v680_v21 = vpop.f32.mrb[2].mxu1  ;;  %v613_v22 = vadd.f32 %v1768_v16, %v612_v20  ;;  %v1921_v23 = vpop.f32.mrb[1].mxu0 }
 0x122   : > { %v750_v24 = vpack.c.bf16 %v678_v18, %v678_v18  ;;  %v1930_v25 = vpop.f32.mrb[3].mxu1  ;;  %v615_v26 = vpop.f32.mrb[2].mxu0 }
 0x123   : > { %v748_v27 = vmul.f32 0.25, %v613_v22  ;;  %v1922_v28 = vpop.f32.mrb[3].mxu0 }
 0x124   : > { %v757_v29 = vsel %vm752_vm2, %v750_v24, 0  ;;  %863 = vrot.lane.b32.xlu0 %v750_v24, %s2241_s13 }
 0x125   : > { %v749_v30 = vpack.c.bf16 %v748_v27, %v748_v27  ;;  %1940 = vmatpush3.bf16.xpose.msra.mxu1 %v757_v29 }
 0x126   : > { %1951 = vmatprep.subr.bf16.mxu1 %v2239_v9 }
 0x128   : > { %860 = vrot.lane.b32.xlu0 %v749_v30, %s2241_s13  ;;  %v742_v51 = vpop.f32.mrb[4].mxu0 }
 0x129   : > { %v1937_v52 = vpop.f32.mrb[5].mxu0  ;;  %v743_v56 = vadd.f32 %v1786_v54, %v742_v51 }
 0x12a   : > { %v745_v53 = vpop.f32.mrb[6].mxu0 }
 0x12b   : > { %v1938_v55 = vpop.f32.mrb[7].mxu0  ;;  %v751_v57 = vpack.c.bf16 %v743_v56, %v743_v56 }
 0x12c   : > { %1942 = vmatmul.mubr.msk.bf16.vlgmr.msra.gmra.mrb[4].mxu1 %vm752_vm2, %v749_v30 }
 0x12d   : > { %1953 = vmatprep.mubr.msk.bf16.mxu1 %vm2240_vm0, %v2239_v9  ;;  %v817_v58 = vsel %vm815_vm4, %v751_v57, 0 }
 0x12e   : > { %1946 = vmatpush3.bf16.msra.mxu0 %v817_v58 }
 0x12f   : > { %1957 = vmatprep.subr.bf16.mxu0 %v2239_v9 }
 0x196   : > { %v864_v33 = vpop.permute.xlu0 %863 }
 0x197   : > { %v869_v34 = vsel %vm752_vm2, %v864_v33, 0 }
 0x198   : > { %1952 = vmatpush3.bf16.xpose.msra.mxu1 %v869_v34 }
 0x199   : > { %1963 = vmatprep.subr.bf16.mxu1 %v2239_v9 }
 0x19a   : > { %v861_v35 = vpop.permute.xlu0 %860 }
 0x19f   : > { %1954 = vmatmul.mubr.msk.bf16.vlgmr.msra.gmra.mrb[8].mxu1 %vm752_vm2, %v861_v35 }
 0x1a0   : > { %1967 = vmatprep.mubr.msk.bf16.mxu1 %vm2240_vm0, %v2239_v9  ;;  %1964 = vmatpush3.bf16.msra.mxu1 %v2069_v11 }
 0x1a1   : > { %1965 = vmatprep.subr.bf16.mxu1 %v2239_v9 }
 0x1a4   : > { %1966 = vmatpush3.bf16.msra.mxu1 %v2070_v17 }
 0x1ff   : > { %v793_v36 = vpop.f32.mrb[4].mxu1 }
 0x200   : > { %v1943_v37 = vpop.f32.mrb[5].mxu1  ;;  %v800_v38 = vsel %vm799_vm3, %v793_v36, -inf }
 0x201   : > { %801 = vmax.xlane.f32.xlu1 %v800_v38  ;;  %v796_v39 = vpop.f32.mrb[6].mxu1 }
 0x202   : > { %v1944_v40 = vpop.f32.mrb[7].mxu1 }
 0x272   : > { %v905_v41 = vpop.f32.mrb[8].mxu1 }
 0x273   : > { %v1955_v42 = vpop.f32.mrb[9].mxu1  ;;  %v911_v43 = vsel %vm799_vm3, %v905_v41, -inf }
 0x274   : > { %912 = vmax.xlane.f32.xlu1 %v911_v43  ;;  %v908_v44 = vpop.f32.mrb[10].mxu1  ;;  %v1799_v42 = vld [vmem:[%s2673_s6] ss:$0 sm:$0xff] }
 0x275   : > { %v1956_v45 = vpop.f32.mrb[11].mxu1 }
 0x28e   : > { %v802_v46 = vpop.xlane.xlu1 %801 }
 0x28f   : > { %v803_v47 = vsub.f32 %v793_v36, %v802_v46 }
 0x291   : > { %v804_v48 = vmul.f32 1.442695, %v803_v47 }
 0x293   : > { %2071 = vpow2.f32 %v804_v48 }
 0x29d   : > { %v2072_v49 = vpop.eup %2071 }
 0x29e   : > { %v806_v50 = vsel %vm799_vm3, %v2072_v49, 0.0 }
 0x29f   : > { %807 = vadd.xlane.f32.xlu0 %v806_v50 }
 0x301   : > { %v913_v59 = vpop.xlane.xlu1 %912 }
 0x302   : > { %v914_v60 = vsub.f32 %v905_v41, %v913_v59  ;;  %v1798_v41 = vld [vmem:[%s2672_s5] ss:$0 sm:$0xff] }
 0x304   : > { %v915_v61 = vmul.f32 1.442695, %v914_v60 }
 0x306   : > { %2073 = vpow2.f32 %v915_v61 }
 0x310   : > { %v2074_v62 = vpop.eup %2073 }
 0x311   : > { %v917_v63 = vsel %vm799_vm3, %v2074_v62, 0.0 }
 0x312   : > { %918 = vadd.xlane.f32.xlu1 %v917_v63 }
 0x323   : > { %924 = vrot.lane.b32.xlu1 %v751_v57, %s2241_s13 }
 0x32c   : > { %v808_v0 = vpop.xlane.xlu0 %807 }
 0x32d   : > { %2075 = vrcp.f32 %v808_v0 }
 0x337   : > { %v2076_v1 = vpop.eup %2075 }
 0x338   : > { %v810_v2 = vmul.f32 %v2076_v1, %v2072_v49 }
 0x33a   : > { %v811_v3 = vpack.c.bf16 %v810_v2, %v810_v2 }
 0x33c   : > { %1948 = vmatmul.mubr.msk.bf16.vlgmr.msra.gmra.mrb[8].mxu0 %vm799_vm3, %v811_v3 }
 0x33d   : > { %1959 = vmatprep.mubr.msk.bf16.mxu0 %vm2240_vm0, %v2239_v9  ;;  %v1794_v9 = vld [vmem:[%s2671_s4] ss:$0 sm:$0xff] }
 0x39f   : > { %v919_v4 = vpop.xlane.xlu1 %918 }
 0x3a0   : > { %2077 = vrcp.f32 %v919_v4 }
 0x3a3   : > { %v925_v5 = vpop.permute.xlu1 %924 }
 0x3a4   : > { %v930_v6 = vsel %vm815_vm4, %v925_v5, 0 }
 0x3a5   : > { %1958 = vmatpush3.bf16.msra.mxu0 %v930_v6 }
 0x3aa   : > { %v2078_v7 = vpop.eup %2077 }
 0x3ab   : > { %v921_v8 = vmul.f32 %v2078_v7, %v2074_v62 }
 0x3ad   : > { %v922_v10 = vpack.c.bf16 %v921_v8, %v921_v8 }
 0x3af   : > { %1960 = vmatmul.mubr.msk.bf16.vlgmr.msra.gmra.mrb[12].mxu0 %vm799_vm3, %v922_v10 }
 0x40f   : > { %v853_v13 = vpop.f32.mrb[8].mxu0 }
 0x410   : > { %v1949_v14 = vpop.f32.mrb[9].mxu0 }
 0x411   : > { %v856_v15 = vpop.f32.mrb[10].mxu0 }
 0x412   : > { %v1950_v16 = vpop.f32.mrb[11].mxu0 }
 0x482   : > { %v966_v18 = vpop.f32.mrb[12].mxu0 }
 0x483   : > { %973 = vrot.lane.b32.xlu1 %v966_v18, %s2242_s16  ;;  %v1961_v19 = vpop.f32.mrb[13].mxu0 }
 0x484   : > { %v969_v20 = vpop.f32.mrb[14].mxu0 }
 0x485   : > { %v1962_v21 = vpop.f32.mrb[15].mxu0 }
 0x4f5   : > { %v974_v22 = vpop.permute.xlu1 %973 }
 0x4f6   : > { %v976_v23 = vsel %vm752_vm2, %v853_v13, %v974_v22 }
 0x4f7   : > { %v977_v24 = vpack.c.bf16 %v976_v23, %v976_v23 }
 0x4f9   : > { %1968 = vmatmul.mubr.msk.bf16.vlgmr.msra.gmra.mrb[12].mxu1 %vm574_vm1, %v977_v24 }
 0x5cc   : > { %v1038_v25 = vpop.f32.mrb[12].mxu1 }
 0x5cd   : > { %v1039_v26 = vadd.f32 %v1794_v9, %v1038_v25  ;;  %v1969_v27 = vpop.f32.mrb[13].mxu1 }
 0x5ce   : > { %v1041_v28 = vpop.f32.mrb[14].mxu1 }
 0x5cf   : > { %v1970_v29 = vpop.f32.mrb[15].mxu1  ;;  %v1044_v30 = vadd.f32 %v1039_v26, %v2457_v12 }
 0x5d1   : > { %v1045_v31 = vsel %vm574_vm1, %v1044_v30, 0.0 }
 0x5d2   : > { %1046 = vadd.xlane.f32.xlu1 %v1045_v31 }
 0x65f   : > { %v1047_v32 = vpop.xlane.xlu1 %1046 }
 0x660   : > { %v1049_v33 = vmul.f32 0.03125, %v1047_v32 }
 0x662   : > { %v1050_v34 = vsub.f32 %v1044_v30, %v1049_v33 }
 0x664   : > { %v1051_v35 = vmul.f32 %v1050_v34, %v1050_v34 }
 0x666   : > { %v1052_v36 = vsel %vm574_vm1, %v1051_v35, 0.0 }
 0x667   : > { %1053 = vadd.xlane.f32.xlu0 %v1052_v36 }
 0x6f4   : > { %v1054_v37 = vpop.xlane.xlu0 %1053 }
 0x6f5   : > { %v1055_v38 = vmul.f32 0.03125, %v1054_v37 }
 0x6f7   : > { %v1056_v39 = vadd.f32 1e-05, %v1055_v38 }
 0x6f9   : > { %2079 = vrsqrt.f32 %v1056_v39 }
 0x703   : > { %v2080_v40 = vpop.eup %2079 }
 0x704   : > { %v1058_v12 = vmul.f32 %v2080_v40, %v1050_v34 }
 0x706   : > { %v1066_v43 = vmul.f32 %v1798_v41, %v1058_v12 }
 0x708   : > { %v1074_v44 = vadd.f32 %v1799_v42, %v1066_v43 }
 0x70a   : > { %1075 = vst.msk [vmem:[#allocation2] sm:$0xff] %vm574_vm1, %v1074_v44  ;;  %v1076_v45 = vpack.c.bf16 %v1074_v44, %v1074_v44 }
 0x70c   : > { %1078 = vst.msk [vmem:[#allocation3] sm:$0xf] %vm1077_vm5, %v1076_v45 }
 0x70d PF: > { %v2081_v46 = vld [vmem:[%s2439_s25 + $0x4] ss:$16 sps:$4 sm:$0xff]   ;;  %v2083_v47 = vld [vmem:[%s2439_s25 + $0xc] ss:$16 sps:$4 sm:$0xff]   ;;  %v2243_v48 = vmov 0   ;;  %vm1151_vm6 = vcmask 261120   ;;  %v1091_v25 = vlaneseq }
 0x70e   : > { %1187 = vmatprep.mubr.bf16.mxu0 %v2243_v48  ;;  %1228 = vmatprep.mubr.bf16.mxu1 %v2243_v48  ;;  %v2085_v49 = vld [vmem:[%s2439_s25] ss:$16 sps:$4 sm:$0xff]   ;;  %v2086_v50 = vld [vmem:[%s2439_s25 + $0x8] ss:$16 sps:$4 sm:$0xff]   ;;  %v2087_v51 = vld [vmem:[%s2439_s25 + $0x24] ss:$16 sps:$4 sm:$0xff]  }
 0x70f   : > { %1155 = vmatprep.subr.bf16.mxu0 %v2081_v46  ;;  %1196 = vmatprep.subr.bf16.mxu1 %v2083_v47  ;;  %v2089_v52 = vld [vmem:[%s2439_s25 + $0x2c] ss:$16 sps:$4 sm:$0xff]   ;;  %v2091_v53 = vld [vmem:[%s2439_s25 + $0x20] ss:$16 sps:$4 sm:$0xff]   ;;  %v2092_v54 = vld [vmem:[%s2439_s25 + $0x28] ss:$16 sps:$4 sm:$0xff]  }
 0x710   : > { %1156 = vmatpush1.bf16.msra.mxu0 %v2085_v49  ;;  %1197 = vmatpush1.bf16.msra.mxu1 %v2086_v50  ;;  %v2093_v56 = vld [vmem:[%s2437_s23 + $0x40] sm:$0xff]   ;;  %v2097_v60 = vld [vmem:[%s2437_s23 + $0x48] sm:$0xff]   ;;  %v2101_v0 = vld [vmem:[%s2437_s23 + $0x50] sm:$0xff]   ;;  %v1092_v26 = vshrl.u32 %v1091_v25, 7  ;;  %p1842_p7 = scmp.ne.s32.totalorder %s2221_s30, 3 }
 0x711   : > { %1157 = vmatprep.subr.bf16.mxu0 %v2087_v51  ;;  %1198 = vmatprep.subr.bf16.mxu1 %v2089_v52  ;;  %v2094_v57 = vld [vmem:[%s2437_s23 + $0xc0] sm:$0xff]   ;;  %v2098_v61 = vld [vmem:[%s2437_s23 + $0xc8] sm:$0xff]   ;;  %v2102_v1 = vld [vmem:[%s2437_s23 + $0xd0] sm:$0xff]   ;;  %s2713_s18 = sld [smem:[#allocation21_spill]] (!%p1842_p7)  ;;  %s2714_s22 = sld [smem:[#allocation22_spill]] (!%p1842_p7) }
 0x712   : > { %v2095_v58 = vld [vmem:[%s2437_s23] sm:$0xff]   ;;  %v2099_v62 = vld [vmem:[%s2437_s23 + $0x8] sm:$0xff]   ;;  %v2103_v2 = vld [vmem:[%s2437_s23 + $0x10] sm:$0xff]   ;;  %v1093_v27 = vsub.s32 0, %v1092_v26  ;;  %v1101_v28 = vsub.s32 2, %v1092_v26  ;;  %v1097_v30 = vsub.s32 1, %v1092_v26 }
 0x713   : > { %v1080_v55 = vld [vmem:[#allocation3] sm:$0xf]  ;;  %v2096_v59 = vld [vmem:[%s2437_s23 + $0x80] sm:$0xff]   ;;  %v2104_v3 = vld [vmem:[%s2437_s23 + $0x90] sm:$0xff]   ;;  %v1105_v31 = vsub.s32 3, %v1092_v26  ;;  %s2715_s16 = sld [smem:[#allocation23_spill]] (!%p1842_p7) }
 0x714   : > { %1158 = vmatpush1.bf16.msra.mxu0 %v2091_v53  ;;  %1199 = vmatpush1.bf16.msra.mxu1 %v2092_v54  ;;  %v2100_v63 = vld [vmem:[%s2437_s23 + $0x88] sm:$0xff]   ;;  %v2105_v4 = vld [vmem:[%s2437_s23 + $0x58] sm:$0xff]   ;;  %v2109_v8 = vld [vmem:[%s2437_s23 + $0x60] sm:$0xff]  }
 0x715   : > { %1871 = vmatprep.subr.bf16.mxu0 %v2093_v56  ;;  %1893 = vmatprep.subr.bf16.mxu1 %v2094_v57  ;;  %v2106_v5 = vld [vmem:[%s2437_s23 + $0xd8] sm:$0xff]   ;;  %v2110_v10 = vld [vmem:[%s2437_s23 + $0xe0] sm:$0xff]   ;;  %v2113_v14 = vld [vmem:[%s2437_s23 + $0x68] sm:$0xff]  }
 0x716   : > { %v2107_v6 = vld [vmem:[%s2437_s23 + $0x18] sm:$0xff]   ;;  %v2111_v11 = vld [vmem:[%s2437_s23 + $0x20] sm:$0xff]   ;;  %v2114_v15 = vld [vmem:[%s2437_s23 + $0xe8] sm:$0xff]  }
 0x717   : > { %1808 = vmatmul.mubr.msk.bf16.vlgmr.msra.gmra.mrb[0].mxu0 %vm1151_vm6, %v1080_v55  ;;  %1809 = vmatmul.mubr.msk.bf16.vlgmr.msra.gmra.mrb[0].mxu1 %vm1151_vm6, %v1080_v55  ;;  %v2108_v7 = vld [vmem:[%s2437_s23 + $0x98] sm:$0xff]   ;;  %v2112_v13 = vld [vmem:[%s2437_s23 + $0xa0] sm:$0xff]   ;;  %v2115_v16 = vld [vmem:[%s2437_s23 + $0x28] sm:$0xff]  }
 0x718   : > { %1872 = vmatpush3.bf16.msra.mxu0 %v2095_v58  ;;  %1894 = vmatpush3.bf16.msra.mxu1 %v2096_v59  ;;  %v2116_v17 = vld [vmem:[%s2437_s23 + $0xa8] sm:$0xff]   ;;  %v2117_v18 = vld [vmem:[%s2437_s23 + $0x70] sm:$0xff]   ;;  %v2121_v22 = vld [vmem:[%s2437_s23 + $0x78] sm:$0xff]  }
 0x719   : > { %1873 = vmatprep.subr.bf16.mxu0 %v2097_v60  ;;  %1895 = vmatprep.subr.bf16.mxu1 %v2098_v61  ;;  %v2118_v19 = vld [vmem:[%s2437_s23 + $0xf0] sm:$0xff]   ;;  %v2122_v23 = vld [vmem:[%s2437_s23 + $0xf8] sm:$0xff]   ;;  %v1089_v29 = vld [vmem:[%s536_s21] sm:$0xf] }
 0x71a   : > { %v2119_v20 = vld [vmem:[%s2437_s23 + $0x30] sm:$0xff]   ;;  %v2123_v24 = vld [vmem:[%s2437_s23 + $0x38] sm:$0xff]   ;;  %v1094_v32 = vrot.slane %v1089_v29, %v1093_v27  ;;  %v1102_v33 = vrot.slane %v1089_v29, %v1101_v28  ;;  %v1098_v34 = vrot.slane %v1089_v29, %v1097_v30  ;;  %v1106_v35 = vrot.slane %v1089_v29, %v1105_v31 }
 0x71b   : > { %v2120_v21 = vld [vmem:[%s2437_s23 + $0xb0] sm:$0xff]   ;;  %v2124_v9 = vld [vmem:[%s2437_s23 + $0xb8] sm:$0xff]  }
 0x71c   : > { %1874 = vmatpush3.bf16.msra.mxu0 %v2099_v62  ;;  %1896 = vmatpush3.bf16.msra.mxu1 %v2100_v63  ;;  %v1241_v63 = vld [vmem:[#allocation4] sm:$0xff] }
 0x71d   : > { %1875 = vmatprep.subr.bf16.mxu0 %v2101_v0  ;;  %1897 = vmatprep.subr.bf16.mxu1 %v2102_v1 }
 0x720   : > { %1876 = vmatpush3.bf16.msra.mxu0 %v2103_v2  ;;  %1898 = vmatpush3.bf16.msra.mxu1 %v2104_v3 }
 0x721   : > { %1877 = vmatprep.subr.bf16.mxu0 %v2105_v4  ;;  %1899 = vmatprep.subr.bf16.mxu1 %v2106_v5  ;;  %v1588_v4 = vld [vmem:[#allocation2] sm:$0xff] (!%p1842_p7) }
 0x724   : > { %1878 = vmatpush3.bf16.msra.mxu0 %v2107_v6  ;;  %1900 = vmatpush3.bf16.msra.mxu1 %v2108_v7  ;;  %v1843_v6 = vld [vmem:[%s2713_s18] ss:$0 sm:$0xff] (!%p1842_p7) }
 0x725   : > { %1879 = vmatprep.subr.bf16.mxu0 %v2109_v8  ;;  %1901 = vmatprep.subr.bf16.mxu1 %v2110_v10 }
 0x728   : > { %1880 = vmatpush3.bf16.msra.mxu0 %v2111_v11  ;;  %1902 = vmatpush3.bf16.msra.mxu1 %v2112_v13 }
 0x729   : > { %1881 = vmatprep.subr.bf16.mxu0 %v2113_v14  ;;  %1903 = vmatprep.subr.bf16.mxu1 %v2114_v15 }
 0x72c   : > { %1882 = vmatpush3.bf16.msra.mxu0 %v2115_v16  ;;  %1904 = vmatpush3.bf16.msra.mxu1 %v2116_v17 }
 0x72d   : > { %1883 = vmatprep.subr.bf16.mxu0 %v2117_v18  ;;  %1905 = vmatprep.subr.bf16.mxu1 %v2118_v19 }
 0x730   : > { %1884 = vmatpush3.bf16.msra.mxu0 %v2119_v20  ;;  %1906 = vmatpush3.bf16.msra.mxu1 %v2120_v21  ;;  %v1844_v21 = vld [vmem:[%s2714_s22] ss:$0 sm:$0xff] (!%p1842_p7) }
 0x731   : > { %1885 = vmatprep.subr.bf16.mxu0 %v2121_v22  ;;  %1907 = vmatprep.subr.bf16.mxu1 %v2122_v23  ;;  %v1845_v23 = vld [vmem:[%s2715_s16] ss:$0 sm:$0xff] (!%p1842_p7) }
 0x734   : > { %1886 = vmatpush3.bf16.msra.mxu0 %v2123_v24  ;;  %1908 = vmatpush3.bf16.msra.mxu1 %v2124_v9 }
 0x7ea   : > { %v1189_v36 = vpop.f32.mrb[0].mxu0  ;;  %v1230_v37 = vpop.f32.mrb[0].mxu1 }
 0x7eb   : > { %v1190_v38 = vadd.f32 %v1189_v36, %v1094_v32  ;;  %v1231_v39 = vadd.f32 %v1230_v37, %v1102_v33  ;;  %v1191_v40 = vpop.f32.mrb[1].mxu0  ;;  %v1232_v41 = vpop.f32.mrb[1].mxu1 }
 0x7ec   : > { %v1192_v12 = vadd.f32 %v1191_v40, %v1098_v34  ;;  %v1233_v42 = vadd.f32 %v1232_v41, %v1106_v35  ;;  %v1193_v43 = vpop.f32.mrb[2].mxu0  ;;  %v1234_v44 = vpop.f32.mrb[2].mxu1 }
 0x7ed   : > { %v1237_v45 = vmax.f32 %v1190_v38, 0.0  ;;  %v1239_v46 = vmax.f32 %v1231_v39, 0.0  ;;  %v1194_v47 = vpop.f32.mrb[3].mxu0  ;;  %v1235_v48 = vpop.f32.mrb[3].mxu1 }
 0x7ee   : > { %v1238_v49 = vmax.f32 %v1192_v12, 0.0  ;;  %v1240_v50 = vmax.f32 %v1233_v42, 0.0 }
 0x7ef   : > { %v1242_v53 = vpack.c.bf16 %v1237_v45, %v1237_v45  ;;  %v1244_v54 = vpack.c.bf16 %v1239_v46, %v1239_v46 }
 0x7f0   : > { %v1243_v51 = vpack.c.bf16 %v1238_v49, %v1238_v49  ;;  %v1245_v52 = vpack.c.bf16 %v1240_v50, %v1240_v50 }
 0x7f2   : > { %1534 = vmatprep.mubr.bf16.mxu0 %v1243_v51  ;;  %1574 = vmatprep.mubr.bf16.mxu1 %v1245_v52 }
 0x7f3   : > { %1535 = vmatmul.mubr.bf16.vlgmr.msra.gmra.mrb[4].mxu0 %v1242_v53  ;;  %1575 = vmatmul.mubr.bf16.vlgmr.msra.gmra.mrb[4].mxu1 %v1244_v54 }
 0x8c6   : > { %v1887_v55 = vpop.f32.mrb[4].mxu0  ;;  %v1909_v56 = vpop.f32.mrb[4].mxu1 }
 0x8c7   : > { %v1888_v57 = vpop.f32.mrb[5].mxu0  ;;  %v1910_v58 = vpop.f32.mrb[5].mxu1 }
 0x8c8   : > { %v1889_v59 = vadd.f32 %v1888_v57, %v1887_v55  ;;  %v1911_v60 = vadd.f32 %v1910_v58, %v1909_v56  ;;  %v1890_v61 = vpop.f32.mrb[6].mxu0  ;;  %v1912_v62 = vpop.f32.mrb[6].mxu1  ;;  %1587 = sbr.rel (%p1842_p7) target bundleno = 2580 (0xa14), region = 103 }
 0x8c9   : > { %v1891_v0 = vpop.f32.mrb[7].mxu0  ;;  %v1913_v1 = vpop.f32.mrb[7].mxu1 }
 0x8ca   : > { %v1577_v2 = vadd.f32 %v1911_v60, %v1889_v59 }
 0x8cc   : > { %v1582_v3 = vadd.f32 %v1577_v2, %v1241_v63 }
 0x8ce   : > { %1583 = vst.msk [vmem:[#allocation4] sm:$0xff] %vm1151_vm6, %v1582_v3 }
 0x8d5   : > { %v1589_v5 = vld [vmem:[#allocation4] sm:$0xff] }
 0x8d6   : > { %v1590_v7 = vadd.f32 %v1589_v5, %v1588_v4 }
 0x8d8   : > { %v1598_v8 = vadd.f32 %v1843_v6, %v1590_v7 }
 0x8da   : > { %v1599_v10 = vsel %vm1151_vm6, %v1598_v8, 0.0 }
 0x8db   : > { %1600 = vadd.xlane.f32.xlu0 %v1599_v10 }
 0x968   : > { %v1601_v11 = vpop.xlane.xlu0 %1600 }
 0x969   : > { %v1603_v13 = vmul.f32 0.03125, %v1601_v11 }
 0x96b   : > { %v1604_v14 = vsub.f32 %v1598_v8, %v1603_v13 }
 0x96d   : > { %v1605_v15 = vmul.f32 %v1604_v14, %v1604_v14 }
 0x96f   : > { %v1606_v16 = vsel %vm1151_vm6, %v1605_v15, 0.0 }
 0x970   : > { %1607 = vadd.xlane.f32.xlu0 %v1606_v16 }
 0x9fd   : > { %v1608_v17 = vpop.xlane.xlu0 %1607 }
 0x9fe   : > { %v1609_v18 = vmul.f32 0.03125, %v1608_v17 }
 0xa00   : > { %v1610_v19 = vadd.f32 1e-05, %v1609_v18 }
 0xa02   : > { %2125 = vrsqrt.f32 %v1610_v19 }
 0xa0c   : > { %v2126_v20 = vpop.eup %2125 }
 0xa0d   : > { %v1612_v22 = vmul.f32 %v2126_v20, %v1604_v14 }
 0xa0f   : > { %v1620_v24 = vmul.f32 %v1844_v21, %v1612_v22 }
 0xa11   : > { %v1628_v9 = vadd.f32 %v1845_v23, %v1620_v24 }
 0xa13   : > { %1629 = vst.msk [vmem:[%s527_s17] sm:$0xff] %vm1151_vm6, %v1628_v9 }
 0xa14 PF: > { %s1847_s13 = sshll.u32 %s2225_s14, 7  ;;  %s2716_s15 = sld [smem:[#allocation24_spill]] }
 0xa15   : > { %s1644_s29 = sshll.u32 %s527_s17, 4  ;;  %s2718_s25 = sand.u32 1, %s2205_s26   ;;  %s1645_s29 = int_to_ptr.vmem [resolvable:$true] %s1644_s29 }
 0xa16   : > { %s1631_s23 = scalar_lea.sflag [#allocation7], %s2718_s25  ;;  %s2127_s21 = scalar_lea.vmem %s1645_s29, 128 }
 0xa17   : > { %p2128_p8 = scmp.ne.s32.totalorder %s1645_s29, %s2127_s21  ;;  %s2244_s18 = smov [#allocation6]  }
 0xa18   : > { %s2131_s30 = sshll.u32 %s2244_s18, 4  ;;  %s2132_s30 = int_to_ptr.vmem [resolvable:$false] %s2131_s30 }
 0xa19   : > { %p2129_p9 = pnand %p2128_p8, %p2394_p10  ;;  %s2133_s24 = scalar_lea.vmem %s2132_s30, 256 }
 0xa1a   : > { %s2717_s20 = smov %s2716_s15  ;;  %s2610_s27 = scalar_lea.hbm %s2716_s15, %s1847_s13 }
 0xa1b   : > { %p2130_p11 = pneg %p2129_p9  ;;  %p2134_p13 = scmp.lt.s32.totalorder %s1645_s29, %s2132_s30 }
 0xa1c   : > { %p2135_p0 = scmp.lt.s32.totalorder %s2133_s24, %s2127_s21 }
 0xa1e   : > { %p2136_p1 = por %p2135_p0, %p2134_p13 }
 0xa20   : > { %p2137_p2 = pnand %p2136_p1, %p2130_p11 }
 0xa22   : > { %2140 = shalt.err (!%p2137_p2)
}
 0xa23   : > { %s2141_s14 = scalar_lea.hbm %s2610_s27, 128  ;;  %s2145_s22 = scalar_lea.hbm %s2717_s20, 256 }
 0xa24   : > { %p2142_p3 = scmp.ne.s32.totalorder %s2610_s27, %s2141_s14  ;;  %p2146_p6 = scmp.lt.u32.totalorder %s2610_s27, %s2717_s20 }
 0xa25   : > { %p2147_p7 = scmp.lt.u32.totalorder %s2145_s22, %s2141_s14  ;;  %p2149_p9 = scmp.lt.u32.totalorder %s2141_s14, %s2610_s27 }
 0xa26   : > { %p2143_p4 = pnand %p2142_p3, %p2394_p10 }
 0xa27   : > { %p2148_p8 = por %p2147_p7, %p2146_p6 }
 0xa28   : > { %p2144_p5 = pneg %p2143_p4 }
 0xa29   : > { %p2150_p11 = por %p2149_p9, %p2148_p8 }
 0xa2b   : > { %p2151_p13 = pnand %p2150_p11, %p2144_p5 }
 0xa2d   : > { %2154 = shalt.err (!%p2151_p13)
}
 0xa2e   : > { %1971 = dma.vmem_to_hbm [thread:$0]  (%p2394_p10), %s1645_s29, 128, %s2610_s27, %s1631_s23  }
 0xa2f PF: > { %s2719_s16 = sld [smem:[#allocation14_spill]]  ;;  %s2720_s13 = sld [smem:[#allocation9_spill]] }
 0xa35   : > { %p1977_p0 = scmp.ge.s32.totalorder %s2719_s16, 2  ;;  %s1656_s12 = sand.u32 1, %s2720_s13  }
 0xa36   : > { %s1657_s15 = scalar_lea.sflag [#allocation7], %s1656_s12 }
 0xa37   : > { %p1974_p1 = pnand %p1977_p0, %p2401_p12 }
 0xa39   : > { %2196 = dma.done.wait (!%p1974_p1), %s1657_s15, 128  }
 0xa3a   : > { %2198 = vsyncadd (!%p1974_p1), %s1657_s15, 4294967168  ;;  %s26_s17 = sadd.s32 1, %s2719_s16   ;;  %s2722_s21 = sld [smem:[#allocation10_spill]] }
 0xa3b   : > { %p23_p2 = scmp.ge.s32.totalorder %s26_s17, 10   ;;  %s2723_s27 = sld [smem:[#allocation18_spill]] }
 0xa3c   : > { %s2724_s28 = sld [smem:[#allocation11_spill]]  ;;  %s2725_s29 = sld [smem:[#allocation17_spill]] }
 0xa3d   : > { %s2726_s30 = sld [smem:[#allocation12_spill]]  ;;  %s2727_s14 = sld [smem:[#allocation13_spill]] }
 0xa3e   : > { %s2728_s15 = sld [smem:[#allocation15_spill]]  ;;  %s2729_s16 = sld [smem:[#allocation16_spill]] }
 0xa3f   : > { %s2730_s25 = smov %s2205_s26  ;;  %25 = sbr.rel (!%p23_p2) target bundleno = 12 (0xc), region = 156 }
 0xa40   : > { %s2731_s26 = smov %s2722_s21 }
 0xa46   :  { %1662 = vsyncpa [#allocation7], 1 }
 0xa47   :  { %1664 = vsyncpa [#allocation7 + $0x1], 1 }

// kernel: tpu_custom_call.1
= control target key start
LH: loop header
LB: loop body
LE: loop exit
PB: predicated region body
PF: predicated region fallthrough
CT: control target
= control target key end

     0   :  { %s2667_s0 = inlined_call_operand.vmem [shape: f32[2,8,32], index: 0, kind: input, shape index: {}]   ;;  %s2668_s1 = inlined_call_operand.vmem [shape: bf16[3,32,32], index: 1, kind: input, shape index: {}]   ;;  %s2669_s2 = inlined_call_operand.vmem [shape: f32[3,1,32], index: 2, kind: input, shape index: {}]   ;;  %s2670_s3 = inlined_call_operand.vmem [shape: bf16[32,32], index: 3, kind: input, shape index: {}]   ;;  %s2671_s4 = inlined_call_operand.vmem [shape: f32[1,32], index: 4, kind: input, shape index: {}]   ;;  %s2672_s5 = inlined_call_operand.vmem [shape: f32[1,32], index: 5, kind: input, shape index: {}]   ;;  %s2673_s6 = inlined_call_operand.vmem [shape: f32[1,32], index: 6, kind: input, shape index: {}]   ;;  %s2674_s7 = inlined_call_operand.vmem [shape: bf16[32,2048], index: 7, kind: input, shape index: {}]   ;;  %s2675_s8 = inlined_call_operand.vmem [shape: f32[1,2048], index: 8, kind: input, shape index: {}]   ;;  %s2676_s9 = inlined_call_operand.vmem [shape: bf16[2048,32], index: 9, kind: input, shape index: {}]   ;;  %s2677_s10 = inlined_call_operand.vmem [shape: f32[1,32], index: 10, kind: input, shape index: {}]   ;;  %s2678_s11 = inlined_call_operand.vmem [shape: f32[1,32], index: 11, kind: input, shape index: {}]   ;;  %s2679_s12 = inlined_call_operand.vmem [shape: f32[1,32], index: 12, kind: input, shape index: {}]   ;;  %s2680_s13 = inlined_call_operand.hbm [shape: f32[2,8,32], index: 13, kind: output, shape index: {}]  }
   0x1   :  { %2693 = sst [smem:[#allocation20_spill]] %s2674_s7 }
   0x2   :  { %2694 = sst [smem:[#allocation21_spill]] %s2677_s10 }
   0x3   :  { %2695 = sst [smem:[#allocation22_spill]] %s2678_s11 }
   0x4   :  { %2696 = sst [smem:[#allocation23_spill]] %s2679_s12 }
   0x5   :  { %2697 = sst [smem:[#allocation24_spill]] %s2680_s13 }
   0x6   :  { %18 = vsyncpa [#allocation7], 0 }
   0x7   :  { %20 = vsyncpa [#allocation7 + $0x1], 0  ;;  %s2315_s25 = smov 0   ;;  %s2317_s26 = smov 0  }
   0x8   :  { %s2319_s27 = smov 0   ;;  %s2321_s28 = smov 0  }
   0x9   :  { %s2323_s29 = smov 0   ;;  %s2325_s30 = smov 0  }
   0xa   :  { %s2327_s14 = smov 0   ;;  %s2329_s15 = smov 0  }
   0xb   :  { %s2331_s16 = smov 0   ;;  %s2333_s17 = smov 0  }
   0xc LB: > { %2698 = sst [smem:[#allocation9_spill]] %s2201_s25  ;;  %s1753_s18 = sadd.s32 4294967295, %s2237_s17   ;;  %s2237_s17 = sphi %s2333_s17, %s26_s17   ;;  %s2233_s16 = sphi %s2331_s16, %s2729_s16   ;;  %s2229_s15 = sphi %s2329_s15, %s2728_s15   ;;  %s2225_s14 = sphi %s2327_s14, %s2727_s14   ;;  %s2221_s30 = sphi %s2325_s30, %s2726_s30   ;;  %s2217_s29 = sphi %s2323_s29, %s2725_s29   ;;  %s2213_s28 = sphi %s2321_s28, %s2724_s28   ;;  %s2209_s27 = sphi %s2319_s27, %s2723_s27   ;;  %s2205_s26 = sphi %s2317_s26, %s2731_s26   ;;  %s2201_s25 = sphi %s2315_s25, %s2730_s25  }
   0xd   : > { %2699 = sst [smem:[#allocation10_spill]] %s2209_s27  ;;  %s1754_s19 = sadd.s32 4294967294, %s2237_s17  }
   0xe   : > { %2700 = sst [smem:[#allocation11_spill]] %s2217_s29  ;;  %s35_s20 = sadd.s32 1, %s2229_s15 }
   0xf   : > { %2701 = sst [smem:[#allocation12_spill]] %s2229_s15  ;;  %s38_s21 = sadd.s32 1, %s2233_s16 }
  0x10   : > { %2702 = sst [smem:[#allocation13_spill]] %s2233_s16  ;;  %p36_p0 = scmp.ge.s32.totalorder %s35_s20, 4 }
  0x11   : > { %2703 = sst [smem:[#allocation14_spill]] %s2237_s17  ;;  %s197_s22 = sadd.s32 1, %s2217_s29 }
  0x12   : > { %p204_p1 = scmp.ne.s32.totalorder %s2217_s29, %s2213_s28  ;;  %p205_p2 = scmp.eq.s32.totalorder %s2237_s17, 0 }
  0x13   : > { %s2733_s20 = smov (%p36_p0, %s35_s20), 0  ;;  %s2735_s21 = smov (!%p36_p0, %s38_s21), %s2233_s16 }
  0x14   : > { %2704 = sst [smem:[#allocation15_spill]] %s2733_s20  ;;  %s194_s23 = ssub.s32 %s2229_s15, %s2733_s20 }
  0x15   : > { %p2378_p3 = por %p205_p2, %p204_p1  ;;  %p40_p4 = scmp.ge.s32.totalorder %s2735_s21, 2 }
  0x16   : > { %p195_p5 = scmp.eq.s32.totalorder %s194_s23, 0  ;;  %s338_s13 = sadd.s32 1, %s2209_s27 }
  0x17   : > { %p348_p6 = scmp.ne.s32.totalorder %s2209_s27, %s2205_s26  ;;  %s2737_s21 = smov (%p40_p4, %s2735_s21), 0 }
  0x18   : > { %2706 = sst [smem:[#allocation16_spill]] %s2737_s21  ;;  %s335_s11 = ssub.s32 %s2233_s16, %s2737_s21 }
  0x19   : > { %s2388_s12 = scalar_select %p195_p5, %s2217_s29, %s197_s22  }
  0x1a   : > { %p349_p7 = scmp.eq.s32.totalorder %s1753_s18, 7  ;;  %p336_p8 = scmp.eq.s32.totalorder %s335_s11, 0 }
  0x1b   : > { %2707 = sst [smem:[#allocation17_spill]] %s2388_s12  ;;  %p354_p9 = scmp.ne.s32.totalorder %s2205_s26, %s2201_s25 }
  0x1c   : > { %p2394_p10 = por %p349_p7, %p348_p6  ;;  %p355_p11 = scmp.eq.s32.totalorder %s1754_s19, 7 }
  0x1d   : > { %s2399_s20 = scalar_select %p336_p8, %s2209_s27, %s338_s13  }
  0x1e   : > { %p2401_p12 = por %p355_p11, %p354_p9  ;;  %p1756_p13 = scmp.ge.s32.totalorder %s2237_s17, 8 }
  0x1f   : > { %2709 = sst [smem:[#allocation18_spill]] %s2399_s20 }
  0x20   : > { %s2710_s23 = scalar_select %p2401_p12, 1, 0 }
  0x21   : > { %398 = sbr.rel (%p1756_p13) target bundleno = 54 (0x36), region = 52 }
  0x22   : > { %2711 = sst [smem:[#allocation19_spill]] %s2710_s23 }
  0x28   : > { %408 = sbr.rel (!%p2378_p3) target bundleno = 54 (0x36), region = 60  ;;  %s410_s11 = sand.u32 (%p2378_p3), 1, %s2217_s29  }
  0x29   : > { %s1850_s18 = sshll.u32 (%p2378_p3), %s2229_s15, 4  ;;  %s1757_s22 = sshll.u32 (%p2378_p3), %s410_s11, 6 }
  0x2a   : > { %s2712_s7 = sld [smem:[#allocation20_spill]] (%p2378_p3)  ;;  %s412_s19 = scalar_lea.vmem (%p2378_p3), [#allocation5], %s1757_s22 }
  0x30   : > { %s415_s13 = scalar_lea.vmem %s2712_s7, %s1850_s18 }
  0x31   : > { %v428_v0 = vld [vmem:[%s415_s13] sm:$0xff]  ;;  %v430_v1 = vld [vmem:[%s415_s13 + $0x8] sm:$0xff] }
  0x32   : > { %v432_v2 = vld [vmem:[%s415_s13 + $0x40] sm:$0xff]  ;;  %429 = vst [vmem:[%s412_s19] sm:$0xff] %v428_v0  ;;  %431 = vst [vmem:[%s412_s19 + $0x8] sm:$0xff] %v430_v1  ;;  %v434_v3 = vld [vmem:[%s415_s13 + $0x48] sm:$0xff] }
  0x33   : > { %433 = vst [vmem:[%s412_s19 + $0x10] sm:$0xff] %v432_v2  ;;  %v436_v4 = vld [vmem:[%s415_s13 + $0x80] sm:$0xff]  ;;  %v438_v5 = vld [vmem:[%s415_s13 + $0x88] sm:$0xff]  ;;  %435 = vst [vmem:[%s412_s19 + $0x18] sm:$0xff] %v434_v3 }
  0x34   : > { %437 = vst [vmem:[%s412_s19 + $0x20] sm:$0xff] %v436_v4  ;;  %439 = vst [vmem:[%s412_s19 + $0x28] sm:$0xff] %v438_v5  ;;  %v440_v6 = vld [vmem:[%s415_s13 + $0xc0] sm:$0xff]  ;;  %v442_v7 = vld [vmem:[%s415_s13 + $0xc8] sm:$0xff] }
  0x35   : > { %441 = vst [vmem:[%s412_s19 + $0x30] sm:$0xff] %v440_v6  ;;  %443 = vst [vmem:[%s412_s19 + $0x38] sm:$0xff] %v442_v7 }
  0x36 PF: > { %p1760_p0 = scmp.ge.s32.totalorder %s2237_s17, 1  ;;  %p465_p1 = scmp.lt.s32.totalorder %s2237_s17, 9 }
  0x38   : > { %p466_p2 = pnand %p1760_p0, %p465_p1 }
  0x39   : > { %s472_s16 = sand.u32 (!%p466_p2), 1, %s2213_s28   ;;  %s2686_s21 = sand.u32 (!%p466_p2), 1, %s2205_s26  }
  0x3a   : > { %469 = sbr.rel (%p466_p2) target bundleno = 2607 (0xa2f), region = 91  ;;  %s1761_s24 = sshll.u32 (!%p466_p2), %s472_s16, 6 }
  0x3b   : > { %s2419_s11 = sshll.u32 (!%p466_p2), %s2686_s21, 3  ;;  %p528_p3 = scmp.lt.s32.totalorder (!%p466_p2), %s2225_s14, 1 }
  0x3c   : > { %s1764_s18 = sshll.u32 (!%p466_p2), %s2221_s30, 2  ;;  %s1765_s22 = sshll.u32 (!%p466_p2), %s2221_s30, 6 }
  0x3d   : > { %p534_p4 = scmp.lt.s32.totalorder (!%p466_p2), %s1764_s18, 15  ;;  %p539_p5 = scmp.lt.s32.totalorder (!%p466_p2), %s1765_s22, 255 }
  0x3e   : > { %s2439_s25 = scalar_lea.vmem (!%p466_p2), [#allocation5], %s1761_s24  ;;  %s527_s17 = scalar_lea.vmem (!%p466_p2), [#allocation6], %s2419_s11 }
  0x3f   : > { %p1767_p6 = scmp.ne.s32.totalorder (!%p466_p2), %s2221_s30, 0 }
  0x41   : > { %s529_s13 = scalar_select %p528_p3, %s2225_s14, 1 }
  0x42   : > { %s2739_s18 = smov (!%p534_p4, %s1764_s18), 15  ;;  %s2741_s22 = smov (!%p539_p5, %s1765_s22), 255 }
  0x43   : > { %s1763_s19 = sshll.u32 %s529_s13, 3  ;;  %s536_s21 = scalar_lea.vmem %s2675_s8, %s2739_s18  ;;  %v2063_v8 = vld [vmem:[%s2668_s1 + $0x10] sm:$0xff] (!%p1767_p6)   ;;  %v2239_v9 = vmov (!%p1767_p6), 0.0   ;;  %v2064_v10 = vld [vmem:[%s2668_s1] sm:$0xff] (!%p1767_p6)   ;;  %v2065_v11 = vld [vmem:[%s2668_s1 + $0x18] sm:$0xff] (!%p1767_p6)   ;;  %vm2240_vm0 = vmmov (!%p1767_p6), 0  }
  0x44   : > { %s531_s28 = scalar_lea.vmem %s2667_s0, %s1763_s19  ;;  %s1766_s29 = sshll.u32 %s2741_s22, 2  ;;  %1923 = vmatprep.subr.bf16.mxu1 (!%p1767_p6), %v2239_v9  ;;  %1915 = vmatprep.subr.bf16.mxu0 (!%p1767_p6), %v2239_v9  ;;  %vm574_vm1 = vcmask (!%p1767_p6), 261120   ;;  %v2066_v13 = vld [vmem:[%s2668_s1 + $0x8] sm:$0xff] (!%p1767_p6)   ;;  %v1777_v15 = vld [vmem:[%s2669_s2 + $0x1] ss:$0 sm:$0xff] (!%p1767_p6)  ;;  %vm752_vm2 = vcmask (!%p1767_p6), 130048  }
  0x45   : > { %s2437_s23 = scalar_lea.vmem %s2676_s9, %s1766_s29  ;;  %548 = sbr.rel (%p1767_p6) target bundleno = 1805 (0x70d), region = 99  ;;  %1924 = vmatpush3.bf16.msra.mxu1 (!%p1767_p6), %v2063_v8  ;;  %1927 = vmatprep.mubr.msk.bf16.mxu1 (!%p1767_p6), %vm2240_vm0, %v2239_v9  ;;  %v2457_v12 = vld [vmem:[%s531_s28] sm:$0xff] (!%p1767_p6)  ;;  %1079 = vst.msk [vmem:[#allocation4] sm:$0xff] (!%p1767_p6), %vm574_vm1, %v2239_v9  ;;  %v2068_v32 = vld [vmem:[%s2668_s1 + $0x28] sm:$0xff] (!%p1767_p6)   ;;  %vm799_vm3 = vcmask (!%p1767_p6), 64512   ;;  %vm815_vm4 = vcmask (!%p1767_p6), 1043456  }
  0x46   : > { %1925 = vmatprep.subr.bf16.mxu1 (!%p1767_p6), %v2239_v9  ;;  %1916 = vmatpush3.bf16.msra.mxu0 (!%p1767_p6), %v2064_v10  ;;  %v550_v14 = vpack.c.bf16 (!%p1767_p6), %v2457_v12, %v2457_v12  ;;  %v1768_v16 = vld [vmem:[%s2669_s2] ss:$0 sm:$0xff] (!%p1767_p6)  ;;  %s2241_s13 = smov (!%p1767_p6), 112   ;;  %v1786_v54 = vld [vmem:[%s2669_s2 + $0x2] ss:$0 sm:$0xff] (!%p1767_p6)  ;;  %s2242_s16 = smov (!%p1767_p6), 16  }
  0x47   : > { %1917 = vmatprep.subr.bf16.mxu0 (!%p1767_p6), %v2239_v9  ;;  %1919 = vmatprep.mubr.msk.bf16.mxu0 (!%p1767_p6), %vm2240_vm0, %v2239_v9  ;;  %v2067_v31 = vld [vmem:[%s2668_s1 + $0x20] sm:$0xff] (!%p1767_p6)   ;;  %vm1077_vm5 = vcmask (!%p1767_p6), 257024  }
  0x49   : > { %1926 = vmatpush3.bf16.msra.mxu1 (!%p1767_p6), %v2065_v11  ;;  %v2069_v11 = vld [vmem:[%s2670_s3] sm:$0xff] (!%p1767_p6)  }
  0x4a   : > { %1918 = vmatpush3.bf16.msra.mxu0 (!%p1767_p6), %v2066_v13  ;;  %1939 = vmatprep.subr.bf16.mxu1 (!%p1767_p6), %v2239_v9 }
  0x4b   : > { %1931 = vmatprep.subr.bf16.mxu0 (!%p1767_p6), %v2239_v9 }
  0x4c   : > { %1928 = vmatmul.mubr.msk.bf16.vlgmr.msra.gmra.mrb[0].mxu1 %vm574_vm1, %v550_v14 }
  0x4d   : > { %1920 = vmatmul.mubr.msk.bf16.vlgmr.msra.gmra.mrb[0].mxu0 %vm574_vm1, %v550_v14  ;;  %1941 = vmatprep.mubr.msk.bf16.mxu1 %vm2240_vm0, %v2239_v9 }
  0x4e   : > { %1935 = vmatprep.mubr.msk.bf16.mxu0 %vm2240_vm0, %v2239_v9  ;;  %1932 = vmatpush3.bf16.msra.mxu0 %v2067_v31 }
  0x4f   : > { %1933 = vmatprep.subr.bf16.mxu0 %v2239_v9 }
  0x52   : > { %1934 = vmatpush3.bf16.msra.mxu0 %v2068_v32 }
  0x53   : > { %1945 = vmatprep.subr.bf16.mxu0 %v2239_v9 }
  0x55   : > { %1936 = vmatmul.mubr.msk.bf16.vlgmr.msra.gmra.mrb[4].mxu0 %vm574_vm1, %v550_v14 }
  0x56   : > { %1947 = vmatprep.mubr.msk.bf16.mxu0 %vm2240_vm0, %v2239_v9 }
 0x11f   : > { %v677_v17 = vpop.f32.mrb[0].mxu1 }
 0x120   : > { %v678_v18 = vadd.f32 %v1777_v15, %v677_v17  ;;  %v1929_v19 = vpop.f32.mrb[1].mxu1  ;;  %v612_v20 = vpop.f32.mrb[0].mxu0  ;;  %v2070_v17 = vld [vmem:[%s2670_s3 + $0x8] sm:$0xff]  }
 0x121   : > { %v680_v21 = vpop.f32.mrb[2].mxu1  ;;  %v613_v22 = vadd.f32 %v1768_v16, %v612_v20  ;;  %v1921_v23 = vpop.f32.mrb[1].mxu0 }
 0x122   : > { %v750_v24 = vpack.c.bf16 %v678_v18, %v678_v18  ;;  %v1930_v25 = vpop.f32.mrb[3].mxu1  ;;  %v615_v26 = vpop.f32.mrb[2].mxu0 }
 0x123   : > { %v748_v27 = vmul.f32 0.25, %v613_v22  ;;  %v1922_v28 = vpop.f32.mrb[3].mxu0 }
 0x124   : > { %v757_v29 = vsel %vm752_vm2, %v750_v24, 0  ;;  %863 = vrot.lane.b32.xlu0 %v750_v24, %s2241_s13 }
 0x125   : > { %v749_v30 = vpack.c.bf16 %v748_v27, %v748_v27  ;;  %1940 = vmatpush3.bf16.xpose.msra.mxu1 %v757_v29 }
 0x126   : > { %1951 = vmatprep.subr.bf16.mxu1 %v2239_v9 }
 0x128   : > { %860 = vrot.lane.b32.xlu0 %v749_v30, %s2241_s13  ;;  %v742_v51 = vpop.f32.mrb[4].mxu0 }
 0x129   : > { %v1937_v52 = vpop.f32.mrb[5].mxu0  ;;  %v743_v56 = vadd.f32 %v1786_v54, %v742_v51 }
 0x12a   : > { %v745_v53 = vpop.f32.mrb[6].mxu0 }
 0x12b   : > { %v1938_v55 = vpop.f32.mrb[7].mxu0  ;;  %v751_v57 = vpack.c.bf16 %v743_v56, %v743_v56 }
 0x12c   : > { %1942 = vmatmul.mubr.msk.bf16.vlgmr.msra.gmra.mrb[4].mxu1 %vm752_vm2, %v749_v30 }
 0x12d   : > { %1953 = vmatprep.mubr.msk.bf16.mxu1 %vm2240_vm0, %v2239_v9  ;;  %v817_v58 = vsel %vm815_vm4, %v751_v57, 0 }
 0x12e   : > { %1946 = vmatpush3.bf16.msra.mxu0 %v817_v58 }
 0x12f   : > { %1957 = vmatprep.subr.bf16.mxu0 %v2239_v9 }
 0x196   : > { %v864_v33 = vpop.permute.xlu0 %863 }
 0x197   : > { %v869_v34 = vsel %vm752_vm2, %v864_v33, 0 }
 0x198   : > { %1952 = vmatpush3.bf16.xpose.msra.mxu1 %v869_v34 }
 0x199   : > { %1963 = vmatprep.subr.bf16.mxu1 %v2239_v9 }
 0x19a   : > { %v861_v35 = vpop.permute.xlu0 %860 }
 0x19f   : > { %1954 = vmatmul.mubr.msk.bf16.vlgmr.msra.gmra.mrb[8].mxu1 %vm752_vm2, %v861_v35 }
 0x1a0   : > { %1967 = vmatprep.mubr.msk.bf16.mxu1 %vm2240_vm0, %v2239_v9  ;;  %1964 = vmatpush3.bf16.msra.mxu1 %v2069_v11 }
 0x1a1   : > { %1965 = vmatprep.subr.bf16.mxu1 %v2239_v9 }
 0x1a4   : > { %1966 = vmatpush3.bf16.msra.mxu1 %v2070_v17 }
 0x1ff   : > { %v793_v36 = vpop.f32.mrb[4].mxu1 }
 0x200   : > { %v1943_v37 = vpop.f32.mrb[5].mxu1  ;;  %v800_v38 = vsel %vm799_vm3, %v793_v36, -inf }
 0x201   : > { %801 = vmax.xlane.f32.xlu1 %v800_v38  ;;  %v796_v39 = vpop.f32.mrb[6].mxu1 }
 0x202   : > { %v1944_v40 = vpop.f32.mrb[7].mxu1 }
 0x272   : > { %v905_v41 = vpop.f32.mrb[8].mxu1 }
 0x273   : > { %v1955_v42 = vpop.f32.mrb[9].mxu1  ;;  %v911_v43 = vsel %vm799_vm3, %v905_v41, -inf }
 0x274   : > { %912 = vmax.xlane.f32.xlu1 %v911_v43  ;;  %v908_v44 = vpop.f32.mrb[10].mxu1  ;;  %v1799_v42 = vld [vmem:[%s2673_s6] ss:$0 sm:$0xff] }
 0x275   : > { %v1956_v45 = vpop.f32.mrb[11].mxu1 }
 0x28e   : > { %v802_v46 = vpop.xlane.xlu1 %801 }
 0x28f   : > { %v803_v47 = vsub.f32 %v793_v36, %v802_v46 }
 0x291   : > { %v804_v48 = vmul.f32 1.442695, %v803_v47 }
 0x293   : > { %2071 = vpow2.f32 %v804_v48 }
 0x29d   : > { %v2072_v49 = vpop.eup %2071 }
 0x29e   : > { %v806_v50 = vsel %vm799_vm3, %v2072_v49, 0.0 }
 0x29f   : > { %807 = vadd.xlane.f32.xlu0 %v806_v50 }
 0x301   : > { %v913_v59 = vpop.xlane.xlu1 %912 }
 0x302   : > { %v914_v60 = vsub.f32 %v905_v41, %v913_v59  ;;  %v1798_v41 = vld [vmem:[%s2672_s5] ss:$0 sm:$0xff] }
 0x304   : > { %v915_v61 = vmul.f32 1.442695, %v914_v60 }
 0x306   : > { %2073 = vpow2.f32 %v915_v61 }
 0x310   : > { %v2074_v62 = vpop.eup %2073 }
 0x311   : > { %v917_v63 = vsel %vm799_vm3, %v2074_v62, 0.0 }
 0x312   : > { %918 = vadd.xlane.f32.xlu1 %v917_v63 }
 0x323   : > { %924 = vrot.lane.b32.xlu1 %v751_v57, %s2241_s13 }
 0x32c   : > { %v808_v0 = vpop.xlane.xlu0 %807 }
 0x32d   : > { %2075 = vrcp.f32 %v808_v0 }
 0x337   : > { %v2076_v1 = vpop.eup %2075 }
 0x338   : > { %v810_v2 = vmul.f32 %v2076_v1, %v2072_v49 }
 0x33a   : > { %v811_v3 = vpack.c.bf16 %v810_v2, %v810_v2 }
 0x33c   : > { %1948 = vmatmul.mubr.msk.bf16.vlgmr.msra.gmra.mrb[8].mxu0 %vm799_vm3, %v811_v3 }
 0x33d   : > { %1959 = vmatprep.mubr.msk.bf16.mxu0 %vm2240_vm0, %v2239_v9  ;;  %v1794_v9 = vld [vmem:[%s2671_s4] ss:$0 sm:$0xff] }
 0x39f   : > { %v919_v4 = vpop.xlane.xlu1 %918 }
 0x3a0   : > { %2077 = vrcp.f32 %v919_v4 }
 0x3a3   : > { %v925_v5 = vpop.permute.xlu1 %924 }
 0x3a4   : > { %v930_v6 = vsel %vm815_vm4, %v925_v5, 0 }
 0x3a5   : > { %1958 = vmatpush3.bf16.msra.mxu0 %v930_v6 }
 0x3aa   : > { %v2078_v7 = vpop.eup %2077 }
 0x3ab   : > { %v921_v8 = vmul.f32 %v2078_v7, %v2074_v62 }
 0x3ad   : > { %v922_v10 = vpack.c.bf16 %v921_v8, %v921_v8 }
 0x3af   : > { %1960 = vmatmul.mubr.msk.bf16.vlgmr.msra.gmra.mrb[12].mxu0 %vm799_vm3, %v922_v10 }
 0x40f   : > { %v853_v13 = vpop.f32.mrb[8].mxu0 }
 0x410   : > { %v1949_v14 = vpop.f32.mrb[9].mxu0 }
 0x411   : > { %v856_v15 = vpop.f32.mrb[10].mxu0 }
 0x412   : > { %v1950_v16 = vpop.f32.mrb[11].mxu0 }
 0x482   : > { %v966_v18 = vpop.f32.mrb[12].mxu0 }
 0x483   : > { %973 = vrot.lane.b32.xlu1 %v966_v18, %s2242_s16  ;;  %v1961_v19 = vpop.f32.mrb[13].mxu0 }
 0x484   : > { %v969_v20 = vpop.f32.mrb[14].mxu0 }
 0x485   : > { %v1962_v21 = vpop.f32.mrb[15].mxu0 }
 0x4f5   : > { %v974_v22 = vpop.permute.xlu1 %973 }
 0x4f6   : > { %v976_v23 = vsel %vm752_vm2, %v853_v13, %v974_v22 }
 0x4f7   : > { %v977_v24 = vpack.c.bf16 %v976_v23, %v976_v23 }
 0x4f9   : > { %1968 = vmatmul.mubr.msk.bf16.vlgmr.msra.gmra.mrb[12].mxu1 %vm574_vm1, %v977_v24 }
 0x5cc   : > { %v1038_v25 = vpop.f32.mrb[12].mxu1 }
 0x5cd   : > { %v1039_v26 = vadd.f32 %v1794_v9, %v1038_v25  ;;  %v1969_v27 = vpop.f32.mrb[13].mxu1 }
 0x5ce   : > { %v1041_v28 = vpop.f32.mrb[14].mxu1 }
 0x5cf   : > { %v1970_v29 = vpop.f32.mrb[15].mxu1  ;;  %v1044_v30 = vadd.f32 %v1039_v26, %v2457_v12 }
 0x5d1   : > { %v1045_v31 = vsel %vm574_vm1, %v1044_v30, 0.0 }
 0x5d2   : > { %1046 = vadd.xlane.f32.xlu1 %v1045_v31 }
 0x65f   : > { %v1047_v32 = vpop.xlane.xlu1 %1046 }
 0x660   : > { %v1049_v33 = vmul.f32 0.03125, %v1047_v32 }
 0x662   : > { %v1050_v34 = vsub.f32 %v1044_v30, %v1049_v33 }
 0x664   : > { %v1051_v35 = vmul.f32 %v1050_v34, %v1050_v34 }
 0x666   : > { %v1052_v36 = vsel %vm574_vm1, %v1051_v35, 0.0 }
 0x667   : > { %1053 = vadd.xlane.f32.xlu0 %v1052_v36 }
 0x6f4   : > { %v1054_v37 = vpop.xlane.xlu0 %1053 }
 0x6f5   : > { %v1055_v38 = vmul.f32 0.03125, %v1054_v37 }
 0x6f7   : > { %v1056_v39 = vadd.f32 1e-05, %v1055_v38 }
 0x6f9   : > { %2079 = vrsqrt.f32 %v1056_v39 }
 0x703   : > { %v2080_v40 = vpop.eup %2079 }
 0x704   : > { %v1058_v12 = vmul.f32 %v2080_v40, %v1050_v34 }
 0x706   : > { %v1066_v43 = vmul.f32 %v1798_v41, %v1058_v12 }
 0x708   : > { %v1074_v44 = vadd.f32 %v1799_v42, %v1066_v43 }
 0x70a   : > { %1075 = vst.msk [vmem:[#allocation2] sm:$0xff] %vm574_vm1, %v1074_v44  ;;  %v1076_v45 = vpack.c.bf16 %v1074_v44, %v1074_v44 }
 0x70c   : > { %1078 = vst.msk [vmem:[#allocation3] sm:$0xf] %vm1077_vm5, %v1076_v45 }
 0x70d PF: > { %v2081_v46 = vld [vmem:[%s2439_s25 + $0x4] ss:$16 sps:$4 sm:$0xff]   ;;  %v2083_v47 = vld [vmem:[%s2439_s25 + $0xc] ss:$16 sps:$4 sm:$0xff]   ;;  %v2243_v48 = vmov 0   ;;  %vm1151_vm6 = vcmask 261120   ;;  %v1091_v25 = vlaneseq }
 0x70e   : > { %1187 = vmatprep.mubr.bf16.mxu0 %v2243_v48  ;;  %1228 = vmatprep.mubr.bf16.mxu1 %v2243_v48  ;;  %v2085_v49 = vld [vmem:[%s2439_s25] ss:$16 sps:$4 sm:$0xff]   ;;  %v2086_v50 = vld [vmem:[%s2439_s25 + $0x8] ss:$16 sps:$4 sm:$0xff]   ;;  %v2087_v51 = vld [vmem:[%s2439_s25 + $0x24] ss:$16 sps:$4 sm:$0xff]  }
 0x70f   : > { %1155 = vmatprep.subr.bf16.mxu0 %v2081_v46  ;;  %1196 = vmatprep.subr.bf16.mxu1 %v2083_v47  ;;  %v2089_v52 = vld [vmem:[%s2439_s25 + $0x2c] ss:$16 sps:$4 sm:$0xff]   ;;  %v2091_v53 = vld [vmem:[%s2439_s25 + $0x20] ss:$16 sps:$4 sm:$0xff]   ;;  %v2092_v54 = vld [vmem:[%s2439_s25 + $0x28] ss:$16 sps:$4 sm:$0xff]  }
 0x710   : > { %1156 = vmatpush1.bf16.msra.mxu0 %v2085_v49  ;;  %1197 = vmatpush1.bf16.msra.mxu1 %v2086_v50  ;;  %v2093_v56 = vld [vmem:[%s2437_s23 + $0x40] sm:$0xff]   ;;  %v2097_v60 = vld [vmem:[%s2437_s23 + $0x48] sm:$0xff]   ;;  %v2101_v0 = vld [vmem:[%s2437_s23 + $0x50] sm:$0xff]   ;;  %v1092_v26 = vshrl.u32 %v1091_v25, 7  ;;  %p1842_p7 = scmp.ne.s32.totalorder %s2221_s30, 3 }
 0x711   : > { %1157 = vmatprep.subr.bf16.mxu0 %v2087_v51  ;;  %1198 = vmatprep.subr.bf16.mxu1 %v2089_v52  ;;  %v2094_v57 = vld [vmem:[%s2437_s23 + $0xc0] sm:$0xff]   ;;  %v2098_v61 = vld [vmem:[%s2437_s23 + $0xc8] sm:$0xff]   ;;  %v2102_v1 = vld [vmem:[%s2437_s23 + $0xd0] sm:$0xff]   ;;  %s2713_s18 = sld [smem:[#allocation21_spill]] (!%p1842_p7)  ;;  %s2714_s22 = sld [smem:[#allocation22_spill]] (!%p1842_p7) }
 0x712   : > { %v2095_v58 = vld [vmem:[%s2437_s23] sm:$0xff]   ;;  %v2099_v62 = vld [vmem:[%s2437_s23 + $0x8] sm:$0xff]   ;;  %v2103_v2 = vld [vmem:[%s2437_s23 + $0x10] sm:$0xff]   ;;  %v1093_v27 = vsub.s32 0, %v1092_v26  ;;  %v1101_v28 = vsub.s32 2, %v1092_v26  ;;  %v1097_v30 = vsub.s32 1, %v1092_v26 }
 0x713   : > { %v1080_v55 = vld [vmem:[#allocation3] sm:$0xf]  ;;  %v2096_v59 = vld [vmem:[%s2437_s23 + $0x80] sm:$0xff]   ;;  %v2104_v3 = vld [vmem:[%s2437_s23 + $0x90] sm:$0xff]   ;;  %v1105_v31 = vsub.s32 3, %v1092_v26  ;;  %s2715_s16 = sld [smem:[#allocation23_spill]] (!%p1842_p7) }
 0x714   : > { %1158 = vmatpush1.bf16.msra.mxu0 %v2091_v53  ;;  %1199 = vmatpush1.bf16.msra.mxu1 %v2092_v54  ;;  %v2100_v63 = vld [vmem:[%s2437_s23 + $0x88] sm:$0xff]   ;;  %v2105_v4 = vld [vmem:[%s2437_s23 + $0x58] sm:$0xff]   ;;  %v2109_v8 = vld [vmem:[%s2437_s23 + $0x60] sm:$0xff]  }
 0x715   : > { %1871 = vmatprep.subr.bf16.mxu0 %v2093_v56  ;;  %1893 = vmatprep.subr.bf16.mxu1 %v2094_v57  ;;  %v2106_v5 = vld [vmem:[%s2437_s23 + $0xd8] sm:$0xff]   ;;  %v2110_v10 = vld [vmem:[%s2437_s23 + $0xe0] sm:$0xff]   ;;  %v2113_v14 = vld [vmem:[%s2437_s23 + $0x68] sm:$0xff]  }
 0x716   : > { %v2107_v6 = vld [vmem:[%s2437_s23 + $0x18] sm:$0xff]   ;;  %v2111_v11 = vld [vmem:[%s2437_s23 + $0x20] sm:$0xff]   ;;  %v2114_v15 = vld [vmem:[%s2437_s23 + $0xe8] sm:$0xff]  }
 0x717   : > { %1808 = vmatmul.mubr.msk.bf16.vlgmr.msra.gmra.mrb[0].mxu0 %vm1151_vm6, %v1080_v55  ;;  %1809 = vmatmul.mubr.msk.bf16.vlgmr.msra.gmra.mrb[0].mxu1 %vm1151_vm6, %v1080_v55  ;;  %v2108_v7 = vld [vmem:[%s2437_s23 + $0x98] sm:$0xff]   ;;  %v2112_v13 = vld [vmem:[%s2437_s23 + $0xa0] sm:$0xff]   ;;  %v2115_v16 = vld [vmem:[%s2437_s23 + $0x28] sm:$0xff]  }
 0x718   : > { %1872 = vmatpush3.bf16.msra.mxu0 %v2095_v58  ;;  %1894 = vmatpush3.bf16.msra.mxu1 %v2096_v59  ;;  %v2116_v17 = vld [vmem:[%s2437_s23 + $0xa8] sm:$0xff]   ;;  %v2117_v18 = vld [vmem:[%s2437_s23 + $0x70] sm:$0xff]   ;;  %v2121_v22 = vld [vmem:[%s2437_s23 + $0x78] sm:$0xff]  }
 0x719   : > { %1873 = vmatprep.subr.bf16.mxu0 %v2097_v60  ;;  %1895 = vmatprep.subr.bf16.mxu1 %v2098_v61  ;;  %v2118_v19 = vld [vmem:[%s2437_s23 + $0xf0] sm:$0xff]   ;;  %v2122_v23 = vld [vmem:[%s2437_s23 + $0xf8] sm:$0xff]   ;;  %v1089_v29 = vld [vmem:[%s536_s21] sm:$0xf] }
 0x71a   : > { %v2119_v20 = vld [vmem:[%s2437_s23 + $0x30] sm:$0xff]   ;;  %v2123_v24 = vld [vmem:[%s2437_s23 + $0x38] sm:$0xff]   ;;  %v1094_v32 = vrot.slane %v1089_v29, %v1093_v27  ;;  %v1102_v33 = vrot.slane %v1089_v29, %v1101_v28  ;;  %v1098_v34 = vrot.slane %v1089_v29, %v1097_v30  ;;  %v1106_v35 = vrot.slane %v1089_v29, %v1105_v31 }
 0x71b   : > { %v2120_v21 = vld [vmem:[%s2437_s23 + $0xb0] sm:$0xff]   ;;  %v2124_v9 = vld [vmem:[%s2437_s23 + $0xb8] sm:$0xff]  }
 0x71c   : > { %1874 = vmatpush3.bf16.msra.mxu0 %v2099_v62  ;;  %1896 = vmatpush3.bf16.msra.mxu1 %v2100_v63  ;;  %v1241_v63 = vld [vmem:[#allocation4] sm:$0xff] }
 0x71d   : > { %1875 = vmatprep.subr.bf16.mxu0 %v2101_v0  ;;  %1897 = vmatprep.subr.bf16.mxu1 %v2102_v1 }
 0x720   : > { %1876 = vmatpush3.bf16.msra.mxu0 %v2103_v2  ;;  %1898 = vmatpush3.bf16.msra.mxu1 %v2104_v3 }
 0x721   : > { %1877 = vmatprep.subr.bf16.mxu0 %v2105_v4  ;;  %1899 = vmatprep.subr.bf16.mxu1 %v2106_v5  ;;  %v1588_v4 = vld [vmem:[#allocation2] sm:$0xff] (!%p1842_p7) }
 0x724   : > { %1878 = vmatpush3.bf16.msra.mxu0 %v2107_v6  ;;  %1900 = vmatpush3.bf16.msra.mxu1 %v2108_v7  ;;  %v1843_v6 = vld [vmem:[%s2713_s18] ss:$0 sm:$0xff] (!%p1842_p7) }
 0x725   : > { %1879 = vmatprep.subr.bf16.mxu0 %v2109_v8  ;;  %1901 = vmatprep.subr.bf16.mxu1 %v2110_v10 }
 0x728   : > { %1880 = vmatpush3.bf16.msra.mxu0 %v2111_v11  ;;  %1902 = vmatpush3.bf16.msra.mxu1 %v2112_v13 }
 0x729   : > { %1881 = vmatprep.subr.bf16.mxu0 %v2113_v14  ;;  %1903 = vmatprep.subr.bf16.mxu1 %v2114_v15 }
 0x72c   : > { %1882 = vmatpush3.bf16.msra.mxu0 %v2115_v16  ;;  %1904 = vmatpush3.bf16.msra.mxu1 %v2116_v17 }
 0x72d   : > { %1883 = vmatprep.subr.bf16.mxu0 %v2117_v18  ;;  %1905 = vmatprep.subr.bf16.mxu1 %v2118_v19 }
 0x730   : > { %1884 = vmatpush3.bf16.msra.mxu0 %v2119_v20  ;;  %1906 = vmatpush3.bf16.msra.mxu1 %v2120_v21  ;;  %v1844_v21 = vld [vmem:[%s2714_s22] ss:$0 sm:$0xff] (!%p1842_p7) }
 0x731   : > { %1885 = vmatprep.subr.bf16.mxu0 %v2121_v22  ;;  %1907 = vmatprep.subr.bf16.mxu1 %v2122_v23  ;;  %v1845_v23 = vld [vmem:[%s2715_s16] ss:$0 sm:$0xff] (!%p1842_p7) }
 0x734   : > { %1886 = vmatpush3.bf16.msra.mxu0 %v2123_v24  ;;  %1908 = vmatpush3.bf16.msra.mxu1 %v2124_v9 }
 0x7ea   : > { %v1189_v36 = vpop.f32.mrb[0].mxu0  ;;  %v1230_v37 = vpop.f32.mrb[0].mxu1 }
 0x7eb   : > { %v1190_v38 = vadd.f32 %v1189_v36, %v1094_v32  ;;  %v1231_v39 = vadd.f32 %v1230_v37, %v1102_v33  ;;  %v1191_v40 = vpop.f32.mrb[1].mxu0  ;;  %v1232_v41 = vpop.f32.mrb[1].mxu1 }
 0x7ec   : > { %v1192_v12 = vadd.f32 %v1191_v40, %v1098_v34  ;;  %v1233_v42 = vadd.f32 %v1232_v41, %v1106_v35  ;;  %v1193_v43 = vpop.f32.mrb[2].mxu0  ;;  %v1234_v44 = vpop.f32.mrb[2].mxu1 }
 0x7ed   : > { %v1237_v45 = vmax.f32 %v1190_v38, 0.0  ;;  %v1239_v46 = vmax.f32 %v1231_v39, 0.0  ;;  %v1194_v47 = vpop.f32.mrb[3].mxu0  ;;  %v1235_v48 = vpop.f32.mrb[3].mxu1 }
 0x7ee   : > { %v1238_v49 = vmax.f32 %v1192_v12, 0.0  ;;  %v1240_v50 = vmax.f32 %v1233_v42, 0.0 }
 0x7ef   : > { %v1242_v53 = vpack.c.bf16 %v1237_v45, %v1237_v45  ;;  %v1244_v54 = vpack.c.bf16 %v1239_v46, %v1239_v46 }
 0x7f0   : > { %v1243_v51 = vpack.c.bf16 %v1238_v49, %v1238_v49  ;;  %v1245_v52 = vpack.c.bf16 %v1240_v50, %v1240_v50 }
 0x7f2   : > { %1534 = vmatprep.mubr.bf16.mxu0 %v1243_v51  ;;  %1574 = vmatprep.mubr.bf16.mxu1 %v1245_v52 }
 0x7f3   : > { %1535 = vmatmul.mubr.bf16.vlgmr.msra.gmra.mrb[4].mxu0 %v1242_v53  ;;  %1575 = vmatmul.mubr.bf16.vlgmr.msra.gmra.mrb[4].mxu1 %v1244_v54 }
 0x8c6   : > { %v1887_v55 = vpop.f32.mrb[4].mxu0  ;;  %v1909_v56 = vpop.f32.mrb[4].mxu1 }
 0x8c7   : > { %v1888_v57 = vpop.f32.mrb[5].mxu0  ;;  %v1910_v58 = vpop.f32.mrb[5].mxu1 }
 0x8c8   : > { %v1889_v59 = vadd.f32 %v1888_v57, %v1887_v55  ;;  %v1911_v60 = vadd.f32 %v1910_v58, %v1909_v56  ;;  %v1890_v61 = vpop.f32.mrb[6].mxu0  ;;  %v1912_v62 = vpop.f32.mrb[6].mxu1  ;;  %1587 = sbr.rel (%p1842_p7) target bundleno = 2580 (0xa14), region = 103 }
 0x8c9   : > { %v1891_v0 = vpop.f32.mrb[7].mxu0  ;;  %v1913_v1 = vpop.f32.mrb[7].mxu1 }
 0x8ca   : > { %v1577_v2 = vadd.f32 %v1911_v60, %v1889_v59 }
 0x8cc   : > { %v1582_v3 = vadd.f32 %v1577_v2, %v1241_v63 }
 0x8ce   : > { %1583 = vst.msk [vmem:[#allocation4] sm:$0xff] %vm1151_vm6, %v1582_v3 }
 0x8d5   : > { %v1589_v5 = vld [vmem:[#allocation4] sm:$0xff] }
 0x8d6   : > { %v1590_v7 = vadd.f32 %v1589_v5, %v1588_v4 }
 0x8d8   : > { %v1598_v8 = vadd.f32 %v1843_v6, %v1590_v7 }
 0x8da   : > { %v1599_v10 = vsel %vm1151_vm6, %v1598_v8, 0.0 }
 0x8db   : > { %1600 = vadd.xlane.f32.xlu0 %v1599_v10 }
 0x968   : > { %v1601_v11 = vpop.xlane.xlu0 %1600 }
 0x969   : > { %v1603_v13 = vmul.f32 0.03125, %v1601_v11 }
 0x96b   : > { %v1604_v14 = vsub.f32 %v1598_v8, %v1603_v13 }
 0x96d   : > { %v1605_v15 = vmul.f32 %v1604_v14, %v1604_v14 }
 0x96f   : > { %v1606_v16 = vsel %vm1151_vm6, %v1605_v15, 0.0 }
 0x970   : > { %1607 = vadd.xlane.f32.xlu0 %v1606_v16 }
 0x9fd   : > { %v1608_v17 = vpop.xlane.xlu0 %1607 }
 0x9fe   : > { %v1609_v18 = vmul.f32 0.03125, %v1608_v17 }
 0xa00   : > { %v1610_v19 = vadd.f32 1e-05, %v1609_v18 }
 0xa02   : > { %2125 = vrsqrt.f32 %v1610_v19 }
 0xa0c   : > { %v2126_v20 = vpop.eup %2125 }
 0xa0d   : > { %v1612_v22 = vmul.f32 %v2126_v20, %v1604_v14 }
 0xa0f   : > { %v1620_v24 = vmul.f32 %v1844_v21, %v1612_v22 }
 0xa11   : > { %v1628_v9 = vadd.f32 %v1845_v23, %v1620_v24 }
 0xa13   : > { %1629 = vst.msk [vmem:[%s527_s17] sm:$0xff] %vm1151_vm6, %v1628_v9 }
 0xa14 PF: > { %s1847_s13 = sshll.u32 %s2225_s14, 7  ;;  %s2716_s15 = sld [smem:[#allocation24_spill]] }
 0xa15   : > { %s1644_s29 = sshll.u32 %s527_s17, 4  ;;  %s2718_s25 = sand.u32 1, %s2205_s26   ;;  %s1645_s29 = int_to_ptr.vmem [resolvable:$true] %s1644_s29 }
 0xa16   : > { %s1631_s23 = scalar_lea.sflag [#allocation7], %s2718_s25  ;;  %s2127_s21 = scalar_lea.vmem %s1645_s29, 128 }
 0xa17   : > { %p2128_p8 = scmp.ne.s32.totalorder %s1645_s29, %s2127_s21  ;;  %s2244_s18 = smov [#allocation6]  }
 0xa18   : > { %s2131_s30 = sshll.u32 %s2244_s18, 4  ;;  %s2132_s30 = int_to_ptr.vmem [resolvable:$false] %s2131_s30 }
 0xa19   : > { %p2129_p9 = pnand %p2128_p8, %p2394_p10  ;;  %s2133_s24 = scalar_lea.vmem %s2132_s30, 256 }
 0xa1a   : > { %s2717_s20 = smov %s2716_s15  ;;  %s2610_s27 = scalar_lea.hbm %s2716_s15, %s1847_s13 }
 0xa1b   : > { %p2130_p11 = pneg %p2129_p9  ;;  %p2134_p13 = scmp.lt.s32.totalorder %s1645_s29, %s2132_s30 }
 0xa1c   : > { %p2135_p0 = scmp.lt.s32.totalorder %s2133_s24, %s2127_s21 }
 0xa1e   : > { %p2136_p1 = por %p2135_p0, %p2134_p13 }
 0xa20   : > { %p2137_p2 = pnand %p2136_p1, %p2130_p11 }
 0xa22   : > { %2140 = shalt.err (!%p2137_p2)
}
 0xa23   : > { %s2141_s14 = scalar_lea.hbm %s2610_s27, 128  ;;  %s2145_s22 = scalar_lea.hbm %s2717_s20, 256 }
 0xa24   : > { %p2142_p3 = scmp.ne.s32.totalorder %s2610_s27, %s2141_s14  ;;  %p2146_p6 = scmp.lt.u32.totalorder %s2610_s27, %s2717_s20 }
 0xa25   : > { %p2147_p7 = scmp.lt.u32.totalorder %s2145_s22, %s2141_s14  ;;  %p2149_p9 = scmp.lt.u32.totalorder %s2141_s14, %s2610_s27 }
 0xa26   : > { %p2143_p4 = pnand %p2142_p3, %p2394_p10 }
 0xa27   : > { %p2148_p8 = por %p2147_p7, %p2146_p6 }
 0xa28   : > { %p2144_p5 = pneg %p2143_p4 }
 0xa29   : > { %p2150_p11 = por %p2149_p9, %p2148_p8 }
 0xa2b   : > { %p2151_p13 = pnand %p2150_p11, %p2144_p5 }
 0xa2d   : > { %2154 = shalt.err (!%p2151_p13)
}
 0xa2e   : > { %1971 = dma.vmem_to_hbm [thread:$0]  (%p2394_p10), %s1645_s29, 128, %s2610_s27, %s1631_s23  }
 0xa2f PF: > { %s2719_s16 = sld [smem:[#allocation14_spill]]  ;;  %s2720_s13 = sld [smem:[#allocation9_spill]] }
 0xa35   : > { %p1977_p0 = scmp.ge.s32.totalorder %s2719_s16, 2  ;;  %s1656_s12 = sand.u32 1, %s2720_s13  }
 0xa36   : > { %s1657_s15 = scalar_lea.sflag [#allocation7], %s1656_s12 }
 0xa37   : > { %p1974_p1 = pnand %p1977_p0, %p2401_p12 }
 0xa39   : > { %2196 = dma.done.wait (!%p1974_p1), %s1657_s15, 128  }
 0xa3a   : > { %2198 = vsyncadd (!%p1974_p1), %s1657_s15, 4294967168  ;;  %s26_s17 = sadd.s32 1, %s2719_s16   ;;  %s2722_s21 = sld [smem:[#allocation10_spill]] }
 0xa3b   : > { %p23_p2 = scmp.ge.s32.totalorder %s26_s17, 10   ;;  %s2723_s27 = sld [smem:[#allocation18_spill]] }
 0xa3c   : > { %s2724_s28 = sld [smem:[#allocation11_spill]]  ;;  %s2725_s29 = sld [smem:[#allocation17_spill]] }
 0xa3d   : > { %s2726_s30 = sld [smem:[#allocation12_spill]]  ;;  %s2727_s14 = sld [smem:[#allocation13_spill]] }
 0xa3e   : > { %s2728_s15 = sld [smem:[#allocation15_spill]]  ;;  %s2729_s16 = sld [smem:[#allocation16_spill]] }
 0xa3f   : > { %s2730_s25 = smov %s2205_s26  ;;  %25 = sbr.rel (!%p23_p2) target bundleno = 12 (0xc), region = 156 }
 0xa40   : > { %s2731_s26 = smov %s2722_s21 }
 0xa46   :  { %1662 = vsyncpa [#allocation7], 1 }
 0xa47   :  { %1664 = vsyncpa [#allocation7 + $0x1], 1 }

</bundles_post_ra>
